<compile_context>
chip_gen: v6e
topology: v6e:2x2x1
jax: 0.10.0
libtpu: 0.0.40
codegen_flags: <defaults>
</compile_context>

<pallas_src>
import functools
import math

import jax
import jax.numpy as jnp
from jax.experimental import pallas as pl
from jax.experimental.pallas import tpu as pltpu

EPS = 1e-6  # matches partial(nn.LayerNorm, eps=1e-06)


# ---------------- in-kernel math helpers (pure jnp, lower fine in Mosaic) ----------------

def _erf(x, approx_recip=False):
    # Abramowitz & Stegun 7.1.26 rational approximation, |err| <= 1.5e-7.
    a1, a2, a3, a4, a5 = 0.254829592, -0.284496736, 1.421413741, -1.453152027, 1.061405429
    p = 0.3275911
    ax = jnp.abs(x)
    denom = 1.0 + p * ax
    if approx_recip:
        t = pl.reciprocal(denom, approx=True)      # EUP slot, frees VALU
    else:
        t = 1.0 / denom
    poly = ((((a5 * t + a4) * t + a3) * t + a2) * t + a1) * t
    y = 1.0 - poly * jnp.exp(-ax * ax)
    return jnp.where(x >= 0, y, -y)


def _gelu(x, approx_recip=False):
    # exact-form GELU (torch.nn.GELU default, approximate='none'); computed in f32.
    return 0.5 * x * (1.0 + _erf(x * (1.0 / math.sqrt(2.0)), approx_recip))


def _layernorm(x, w, b):
    mu = jnp.mean(x, axis=-1, keepdims=True)
    var = jnp.mean((x - mu) ** 2, axis=-1, keepdims=True)
    return (x - mu) * jax.lax.rsqrt(var + EPS) * w + b


# ---------------------------------- fused Pallas kernel ----------------------------------

def mixer_fused_kernel(x_ref,                                  # (TB, S, D)  original input
                       n1w_ref, n1b_ref,                       # (1, 1, D)   norm1 w, b
                       tw1t_ref, tb1_ref,                      # (1, T, S), (1, T, 1)
                       tw2t_ref, tb2_ref,                      # (1, S, T), (1, S, 1)
                       n2w_ref, n2b_ref,                       # (1, 1, D)   norm2 w, b
                       cw1_ref, cb1_ref,                       # (1, D, C), (1, 1, C)
                       cw2_ref, cb2_ref,                       # (1, C, D), (1, 1, D)
                       nfw_ref, nfb_ref,                       # (1, D)      final norm w, b
                       hw_ref, hb_ref,                         # (D, NC), (1, NC) head
                       o_ref,                                  # (TB, 1, NC) logits
                       acc_ref,                                # (TB, S, D) f32 residual
                       *, approx_recip):
    """Grid = (cdiv(B, TB), L).  One grid step applies one MixerBlock to a tile of TB
    batch rows; the residual stream lives in VMEM scratch across the L axis so the
    per-block weights streamed at this step are reused TB times.  Final LayerNorm +
    mean-pool + classifier head run in the epilogue at l == L-1."""
    l = pl.program_id(1)
    num_blocks = pl.num_programs(1)
    TB = acc_ref.shape[0]

    @pl.when(l == 0)
    def _():
        acc_ref[...] = x_ref[...].astype(jnp.float32)

    wdt = tw1t_ref.dtype                                       # matmul operand dtype (bf16)

    # hoist weight loads out of the unrolled TB loop
    n1w, n1b = n1w_ref[0], n1b_ref[0]                          # (1, D)
    n2w, n2b = n2w_ref[0], n2b_ref[0]                          # (1, D)
    tw1t, tb1 = tw1t_ref[0], tb1_ref[0]                        # (T, S), (T, 1)
    tw2t, tb2 = tw2t_ref[0], tb2_ref[0]                        # (S, T), (S, 1)
    cw1, cb1 = cw1_ref[0], cb1_ref[0]                          # (D, C), (1, C)
    cw2, cb2 = cw2_ref[0], cb2_ref[0]                          # (C, D), (1, D)

    # Static unroll over the batch tile: same weights, TB independent samples.
    for b in range(TB):
        xb = acc_ref[b]                                        # (S, D) f32

        # ---- token-mixing MLP (mixes along S; weights pre-transposed host-side) ----
        y = _layernorm(xb, n1w, n1b)                           # (S, D) f32
        h = _gelu(jnp.dot(tw1t, y.astype(wdt),
                          preferred_element_type=jnp.float32) + tb1,
                  approx_recip)                                # (T, D) f32
        tok = jnp.dot(tw2t, h.astype(wdt),
                      preferred_element_type=jnp.float32) + tb2      # (S, D) f32
        xb = xb + tok

        # ---- channel-mixing MLP (mixes along D) ----
        y2 = _layernorm(xb, n2w, n2b)                          # (S, D) f32
        h2 = _gelu(jnp.dot(y2.astype(wdt), cw1,
                           preferred_element_type=jnp.float32) + cb1,
                   approx_recip)                               # (S, C) f32
        ch = jnp.dot(h2.astype(wdt), cw2,
                     preferred_element_type=jnp.float32) + cb2       # (S, D) f32
        acc_ref[b] = xb + ch

    # ---- epilogue: final LN + mean-pool over tokens + classifier head ----
    @pl.when(l == num_blocks - 1)
    def _():
        nfw, nfb = nfw_ref[...], nfb_ref[...]                  # (1, D)
        hw, hb = hw_ref[...], hb_ref[...]                      # (D, NC), (1, NC)
        for b in range(TB):
            yf = _layernorm(acc_ref[b], nfw, nfb)              # (S, D)
            pooled = jnp.mean(yf, axis=0, keepdims=True)       # (1, D)
            logits = jnp.dot(pooled.astype(hw.dtype), hw,
                             preferred_element_type=jnp.float32) + hb   # (1, NC)
            o_ref[b] = logits.astype(o_ref.dtype)


# ---------------------------------- host-side wrapper ----------------------------------

def _stack_block_params(blocks, compute_dtype):
    """Stack per-block params along a leading L axis; pre-transpose the token-mixing
    weights/biases so the kernel needs no in-kernel transposes; cast matmul weights
    to compute_dtype (bf16 by default)."""
    stk = lambda name: jnp.stack([b[name] for b in blocks], axis=0)
    return dict(
        n1w=stk("n1w"), n1b=stk("n1b"),                                        # (L, 1, D)
        tw1t=jnp.stack([b["tw1"].T for b in blocks], 0).astype(compute_dtype),  # (L, T, S)
        tb1=jnp.stack([b["tb1"].T for b in blocks], 0),                         # (L, T, 1)
        tw2t=jnp.stack([b["tw2"].T for b in blocks], 0).astype(compute_dtype),  # (L, S, T)
        tb2=jnp.stack([b["tb2"].T for b in blocks], 0),                         # (L, S, 1)
        n2w=stk("n2w"), n2b=stk("n2b"),                                        # (L, 1, D)
        cw1=stk("cw1").astype(compute_dtype),                                   # (L, D, C)
        cb1=stk("cb1"),                                                         # (L, 1, C)
        cw2=stk("cw2").astype(compute_dtype),                                   # (L, C, D)
        cb2=stk("cb2"),                                                         # (L, 1, D)
    )


def mlp_mixer_forward(x, params, compute_dtype=jnp.bfloat16, batch_tile=8,
                      vmem_limit_bytes=48 * 1024 * 1024):
    B, S, D = x.shape
    blocks = params["blocks"]
    L = len(blocks)
    sp = _stack_block_params(blocks, compute_dtype)
    T = sp["tw1t"].shape[1]
    C = sp["cw1"].shape[2]
    NC = params["head_w"].shape[1]
    head_w = params["head_w"].astype(compute_dtype)

    # Batch tile: each weight DMA is reused across TB samples.  Pad B up to a multiple
    # of TB (padded rows are garbage-in/garbage-out and sliced off at the end).
    TB = max(1, min(batch_tile, B))
    nb = pl.cdiv(B, TB)
    B_pad = nb * TB
    if B_pad != B:
        x = jnp.pad(x, ((0, B_pad - B), (0, 0), (0, 0)))

    kernel = functools.partial(mixer_fused_kernel,
                               approx_recip=(compute_dtype != jnp.float32))

    blk3 = lambda shape: pl.BlockSpec(shape, lambda b, l: (l, 0, 0))   # per-block weights
    fixed = lambda shape: pl.BlockSpec(shape, lambda b, l: (0, 0))     # final norm / head

    out = pl.pallas_call(
        kernel,
        out_shape=jax.ShapeDtypeStruct((B_pad, 1, NC), jnp.float32),
        grid=(nb, L),
        in_specs=[
            pl.BlockSpec((TB, S, D), lambda b, l: (b, 0, 0)),  # x (consumed at l == 0)
            blk3((1, 1, D)), blk3((1, 1, D)),                  # norm1 w, b
            blk3((1, T, S)), blk3((1, T, 1)),                  # mlp_tokens fc1 (w^T, b col)
            blk3((1, S, T)), blk3((1, S, 1)),                  # mlp_tokens fc2 (w^T, b col)
            blk3((1, 1, D)), blk3((1, 1, D)),                  # norm2 w, b
            blk3((1, D, C)), blk3((1, 1, C)),                  # mlp_channels fc1 w, b
            blk3((1, C, D)), blk3((1, 1, D)),                  # mlp_channels fc2 w, b
            fixed((1, D)), fixed((1, D)),                      # final norm w, b
            fixed((D, NC)), fixed((1, NC)),                    # head w, b
        ],
        out_specs=pl.BlockSpec((TB, 1, NC), lambda b, l: (b, 0, 0)),
        scratch_shapes=[pltpu.VMEM((TB, S, D), jnp.float32)],  # resident residual stream
        compiler_params=pltpu.CompilerParams(
            dimension_semantics=("parallel", "arbitrary"),
            vmem_limit_bytes=vmem_limit_bytes),
    )(x,
      sp["n1w"], sp["n1b"], sp["tw1t"], sp["tb1"], sp["tw2t"], sp["tb2"],
      sp["n2w"], sp["n2b"], sp["cw1"], sp["cb1"], sp["cw2"], sp["cb2"],
      params["norm_w"], params["norm_b"], head_w, params["head_b"])
    return out.reshape(B_pad, NC)[:B]


# ---------------------------------- pure-JAX reference ----------------------------------

def mlp_mixer_ref(x, params):
    for p in params["blocks"]:
        y = _layernorm(x, p["n1w"], p["n1b"])
        yt = jnp.swapaxes(y, 1, 2)                               # (B, D, S)
        h = _gelu(yt @ p["tw1"] + p["tb1"])
        x = x + jnp.swapaxes(h @ p["tw2"] + p["tb2"], 1, 2)
        y2 = _layernorm(x, p["n2w"], p["n2b"])
        h2 = _gelu(y2 @ p["cw1"] + p["cb1"])
        x = x + h2 @ p["cw2"] + p["cb2"]
    x = _layernorm(x, params["norm_w"], params["norm_b"])
    x = jnp.mean(x, axis=1)
    return x @ params["head_w"] + params["head_b"]


# ---------------------------------- parameter init ----------------------------------

def _xavier(key, fan_in, fan_out):
    limit = math.sqrt(6.0 / (fan_in + fan_out))
    return jax.random.uniform(key, (fan_in, fan_out), jnp.float32, -limit, limit)


def init_params(key, num_blocks, seq_len, embed_dim, num_classes, mlp_ratio=(0.5, 4.0)):
    tok = int(mlp_ratio[0] * embed_dim)
    chan = int(mlp_ratio[1] * embed_dim)
    blocks = []
    for _ in range(num_blocks):
        key, k1, k2, k3, k4, kb1, kb2, kb3, kb4 = jax.random.split(key, 9)
        blocks.append(dict(
            n1w=jnp.ones((1, embed_dim), jnp.float32),
            n1b=jnp.zeros((1, embed_dim), jnp.float32),
            tw1=_xavier(k1, seq_len, tok),
            tb1=1e-6 * jax.random.normal(kb1, (1, tok), jnp.float32),
            tw2=_xavier(k2, tok, seq_len),
            tb2=1e-6 * jax.random.normal(kb2, (1, seq_len), jnp.float32),
            n2w=jnp.ones((1, embed_dim), jnp.float32),
            n2b=jnp.zeros((1, embed_dim), jnp.float32),
            cw1=_xavier(k3, embed_dim, chan),
            cb1=1e-6 * jax.random.normal(kb3, (1, chan), jnp.float32),
            cw2=_xavier(k4, chan, embed_dim),
            cb2=1e-6 * jax.random.normal(kb4, (1, embed_dim), jnp.float32),
        ))
    key, kh = jax.random.split(key)
    return dict(
        blocks=blocks,
        norm_w=jnp.ones((1, embed_dim), jnp.float32),
        norm_b=jnp.zeros((1, embed_dim), jnp.float32),
        # NOTE: PyTorch's _init_weights zeroes the head weight (name.startswith('head')),
        # which would make the output identically zero; we use xavier here so the
        # numerical check is non-trivial (init values are synthetic anyway).
        head_w=_xavier(kh, embed_dim, num_classes),
        head_b=jnp.zeros((1, num_classes), jnp.float32),
    )


# ---------------------------------- main ----------------------------------

if __name__ == "__main__":
    B, S, D, NC = 2, 8, 32, 3     # batch, seq_len, hmr_embedd_dim, num_classes
    NUM_BLOCKS = 2                # small config (module default is 8 blocks / D=512 / S=145)

    key = jax.random.PRNGKey(0)
    kparam, kx = jax.random.split(key)
    params = init_params(kparam, NUM_BLOCKS, S, D, NC)
    x = jax.random.normal(kx, (B, S, D), jnp.float32)

    ref = mlp_mixer_ref(x, params)

    # f32 matmul operands + exact erf division: tight check against the f32 reference.
    out_f32 = jax.block_until_ready(
        mlp_mixer_forward(x, params, compute_dtype=jnp.float32))
    assert out_f32.shape == (B, NC)
    assert jnp.allclose(out_f32, ref, atol=1e-4, rtol=1e-4), (out_f32, ref)

    # default (production) path: bf16 matmul operands + EUP reciprocal in erf.
    out_bf16 = jax.block_until_ready(mlp_mixer_forward(x, params))
    assert out_bf16.shape == (B, NC)
    assert jnp.allclose(out_bf16, ref, atol=5e-2, rtol=5e-2), (out_bf16, ref)

    print("KERNEL_OK")
</pallas_src>

<mosaic_0001>
module attributes {stable_mosaic.version = 11 : i64} {
  func.func @mixer_fused_kernel(%arg0: i32, %arg1: i32, %arg2: memref<2x8x32xf32, #tpu.memory_space<vmem>>, %arg3: memref<1x1x32xf32, #tpu.memory_space<vmem>>, %arg4: memref<1x1x32xf32, #tpu.memory_space<vmem>>, %arg5: memref<1x16x8xf32, #tpu.memory_space<vmem>>, %arg6: memref<1x16x1xf32, #tpu.memory_space<vmem>>, %arg7: memref<1x8x16xf32, #tpu.memory_space<vmem>>, %arg8: memref<1x8x1xf32, #tpu.memory_space<vmem>>, %arg9: memref<1x1x32xf32, #tpu.memory_space<vmem>>, %arg10: memref<1x1x32xf32, #tpu.memory_space<vmem>>, %arg11: memref<1x32x128xf32, #tpu.memory_space<vmem>>, %arg12: memref<1x1x128xf32, #tpu.memory_space<vmem>>, %arg13: memref<1x128x32xf32, #tpu.memory_space<vmem>>, %arg14: memref<1x1x32xf32, #tpu.memory_space<vmem>>, %arg15: memref<1x32xf32, #tpu.memory_space<vmem>>, %arg16: memref<1x32xf32, #tpu.memory_space<vmem>>, %arg17: memref<32x3xf32, #tpu.memory_space<vmem>>, %arg18: memref<1x3xf32, #tpu.memory_space<vmem>>, %arg19: memref<2x1x3xf32, #tpu.memory_space<vmem>>, %arg20: memref<2x8x32xf32, #tpu.memory_space<vmem>>) attributes {dimension_semantics = [#tpu.dimension_semantics<parallel>, #tpu.dimension_semantics<arbitrary>], iteration_bounds = array<i64: 1, 2>, scalar_prefetch = 0 : i64, scratch_operands = 1 : i64, tpu.core_type = #tpu.core_type<tc>, window_params = [{transform_indices = @transform_0, window_bounds = array<i64: 2, 8, 32>}, {transform_indices = @transform_1, window_bounds = array<i64: 1, 1, 32>}, {transform_indices = @transform_2, window_bounds = array<i64: 1, 1, 32>}, {transform_indices = @transform_3, window_bounds = array<i64: 1, 16, 8>}, {transform_indices = @transform_4, window_bounds = array<i64: 1, 16, 1>}, {transform_indices = @transform_5, window_bounds = array<i64: 1, 8, 16>}, {transform_indices = @transform_6, window_bounds = array<i64: 1, 8, 1>}, {transform_indices = @transform_7, window_bounds = array<i64: 1, 1, 32>}, {transform_indices = @transform_8, window_bounds = array<i64: 1, 1, 32>}, {transform_indices = @transform_9, window_bounds = array<i64: 1, 32, 128>}, {transform_indices = @transform_10, window_bounds = array<i64: 1, 1, 128>}, {transform_indices = @transform_11, window_bounds = array<i64: 1, 128, 32>}, {transform_indices = @transform_12, window_bounds = array<i64: 1, 1, 32>}, {pipeline_mode = #tpu.pipeline_mode<synchronous>, transform_indices = @transform_13, window_bounds = array<i64: 1, 32>}, {pipeline_mode = #tpu.pipeline_mode<synchronous>, transform_indices = @transform_14, window_bounds = array<i64: 1, 32>}, {pipeline_mode = #tpu.pipeline_mode<synchronous>, transform_indices = @transform_15, window_bounds = array<i64: 32, 3>}, {pipeline_mode = #tpu.pipeline_mode<synchronous>, transform_indices = @transform_16, window_bounds = array<i64: 1, 3>}, {transform_indices = @transform_17, window_bounds = array<i64: 2, 1, 3>}]} {
    %c0_i32 = arith.constant 0 : i32
    %0 = arith.cmpi eq, %arg1, %c0_i32 : i32
    %1 = arith.extui %0 : i1 to i32
    %c0_i32_0 = arith.constant 0 : i32
    %2 = arith.cmpi ne, %1, %c0_i32_0 : i32
    scf.if %2 {
      %c0_135 = arith.constant 0 : index
      %c0_136 = arith.constant 0 : index
      %c0_137 = arith.constant 0 : index
      %316 = vector.load %arg2[%c0_135, %c0_136, %c0_137] : memref<2x8x32xf32, #tpu.memory_space<vmem>>, vector<2x8x32xf32>
      %c0_138 = arith.constant 0 : index
      %c0_139 = arith.constant 0 : index
      %c0_140 = arith.constant 0 : index
      %317 = vector.load %arg20[%c0_138, %c0_139, %c0_140] : memref<2x8x32xf32, #tpu.memory_space<vmem>>, vector<2x8x32xf32>
      tpu.vector_store %arg20[%c0_138, %c0_139, %c0_140], %316 {strides = array<i32>} : memref<2x8x32xf32, #tpu.memory_space<vmem>>, vector<2x8x32xf32>,
    } else {
    }
    %c0 = arith.constant 0 : index
    %c0_1 = arith.constant 0 : index
    %c0_2 = arith.constant 0 : index
    %3 = vector.load %arg3[%c0, %c0_1, %c0_2] : memref<1x1x32xf32, #tpu.memory_space<vmem>>, vector<1x1x32xf32>
    %4 = vector.shape_cast %3 : vector<1x1x32xf32> to vector<1x32xf32>
    %c0_3 = arith.constant 0 : index
    %c0_4 = arith.constant 0 : index
    %c0_5 = arith.constant 0 : index
    %5 = vector.load %arg4[%c0_3, %c0_4, %c0_5] : memref<1x1x32xf32, #tpu.memory_space<vmem>>, vector<1x1x32xf32>
    %6 = vector.shape_cast %5 : vector<1x1x32xf32> to vector<1x32xf32>
    %c0_6 = arith.constant 0 : index
    %c0_7 = arith.constant 0 : index
    %c0_8 = arith.constant 0 : index
    %7 = vector.load %arg9[%c0_6, %c0_7, %c0_8] : memref<1x1x32xf32, #tpu.memory_space<vmem>>, vector<1x1x32xf32>
    %8 = vector.shape_cast %7 : vector<1x1x32xf32> to vector<1x32xf32>
    %c0_9 = arith.constant 0 : index
    %c0_10 = arith.constant 0 : index
    %c0_11 = arith.constant 0 : index
    %9 = vector.load %arg10[%c0_9, %c0_10, %c0_11] : memref<1x1x32xf32, #tpu.memory_space<vmem>>, vector<1x1x32xf32>
    %10 = vector.shape_cast %9 : vector<1x1x32xf32> to vector<1x32xf32>
    %c0_12 = arith.constant 0 : index
    %c0_13 = arith.constant 0 : index
    %c0_14 = arith.constant 0 : index
    %11 = vector.load %arg5[%c0_12, %c0_13, %c0_14] : memref<1x16x8xf32, #tpu.memory_space<vmem>>, vector<1x16x8xf32>
    %12 = vector.shape_cast %11 : vector<1x16x8xf32> to vector<16x8xf32>
    %c0_15 = arith.constant 0 : index
    %c0_16 = arith.constant 0 : index
    %c0_17 = arith.constant 0 : index
    %13 = vector.load %arg6[%c0_15, %c0_16, %c0_17] : memref<1x16x1xf32, #tpu.memory_space<vmem>>, vector<1x16x1xf32>
    %14 = vector.shape_cast %13 : vector<1x16x1xf32> to vector<16x1xf32>
    %c0_18 = arith.constant 0 : index
    %c0_19 = arith.constant 0 : index
    %c0_20 = arith.constant 0 : index
    %15 = vector.load %arg7[%c0_18, %c0_19, %c0_20] : memref<1x8x16xf32, #tpu.memory_space<vmem>>, vector<1x8x16xf32>
    %16 = vector.shape_cast %15 : vector<1x8x16xf32> to vector<8x16xf32>
    %c0_21 = arith.constant 0 : index
    %c0_22 = arith.constant 0 : index
    %c0_23 = arith.constant 0 : index
    %17 = vector.load %arg8[%c0_21, %c0_22, %c0_23] : memref<1x8x1xf32, #tpu.memory_space<vmem>>, vector<1x8x1xf32>
    %18 = vector.shape_cast %17 : vector<1x8x1xf32> to vector<8x1xf32>
    %c0_24 = arith.constant 0 : index
    %c0_25 = arith.constant 0 : index
    %c0_26 = arith.constant 0 : index
    %19 = vector.load %arg11[%c0_24, %c0_25, %c0_26] : memref<1x32x128xf32, #tpu.memory_space<vmem>>, vector<1x32x128xf32>
    %20 = vector.shape_cast %19 : vector<1x32x128xf32> to vector<32x128xf32>
    %c0_27 = arith.constant 0 : index
    %c0_28 = arith.constant 0 : index
    %c0_29 = arith.constant 0 : index
    %21 = vector.load %arg12[%c0_27, %c0_28, %c0_29] : memref<1x1x128xf32, #tpu.memory_space<vmem>>, vector<1x1x128xf32>
    %22 = vector.shape_cast %21 : vector<1x1x128xf32> to vector<1x128xf32>
    %c0_30 = arith.constant 0 : index
    %c0_31 = arith.constant 0 : index
    %c0_32 = arith.constant 0 : index
    %23 = vector.load %arg13[%c0_30, %c0_31, %c0_32] : memref<1x128x32xf32, #tpu.memory_space<vmem>>, vector<1x128x32xf32>
    %24 = vector.shape_cast %23 : vector<1x128x32xf32> to vector<128x32xf32>
    %c0_33 = arith.constant 0 : index
    %c0_34 = arith.constant 0 : index
    %c0_35 = arith.constant 0 : index
    %25 = vector.load %arg14[%c0_33, %c0_34, %c0_35] : memref<1x1x32xf32, #tpu.memory_space<vmem>>, vector<1x1x32xf32>
    %26 = vector.shape_cast %25 : vector<1x1x32xf32> to vector<1x32xf32>
    %c0_36 = arith.constant 0 : index
    %c0_37 = arith.constant 0 : index
    %c0_38 = arith.constant 0 : index
    %27 = vector.load %arg20[%c0_36, %c0_37, %c0_38] : memref<2x8x32xf32, #tpu.memory_space<vmem>>, vector<1x8x32xf32>
    %28 = vector.shape_cast %27 : vector<1x8x32xf32> to vector<8x32xf32>
    %cst = arith.constant dense<0.000000e+00> : vector<8xf32>
    %29 = vector.multi_reduction <add>, %28, %cst [1] : vector<8x32xf32> to vector<8xf32>
    %30 = vector.shape_cast %29 : vector<8xf32> to vector<8x1xf32>
    %cst_39 = arith.constant 3.200000e+01 : f32
    %31 = vector.broadcast %cst_39 : f32 to vector<8x1xf32>
    %32 = arith.divf %30, %31 : vector<8x1xf32>
    %33 = vector.broadcast %32 : vector<8x1xf32> to vector<8x32xf32>
    %34 = arith.subf %28, %33 : vector<8x32xf32>
    %35 = arith.mulf %34, %34 : vector<8x32xf32>
    %cst_40 = arith.constant dense<0.000000e+00> : vector<8xf32>
    %36 = vector.multi_reduction <add>, %35, %cst_40 [1] : vector<8x32xf32> to vector<8xf32>
    %37 = vector.shape_cast %36 : vector<8xf32> to vector<8x1xf32>
    %cst_41 = arith.constant 3.200000e+01 : f32
    %38 = vector.broadcast %cst_41 : f32 to vector<8x1xf32>
    %39 = arith.divf %37, %38 : vector<8x1xf32>
    %40 = vector.broadcast %32 : vector<8x1xf32> to vector<8x32xf32>
    %41 = arith.subf %28, %40 : vector<8x32xf32>
    %cst_42 = arith.constant 9.99999997E-7 : f32
    %42 = vector.broadcast %cst_42 : f32 to vector<8x1xf32>
    %43 = arith.addf %39, %42 : vector<8x1xf32>
    %44 = math.rsqrt %43 : vector<8x1xf32>
    %45 = vector.broadcast %44 : vector<8x1xf32> to vector<8x32xf32>
    %46 = arith.mulf %41, %45 : vector<8x32xf32>
    %47 = vector.broadcast %4 : vector<1x32xf32> to vector<8x32xf32>
    %48 = arith.mulf %46, %47 : vector<8x32xf32>
    %49 = vector.broadcast %6 : vector<1x32xf32> to vector<8x32xf32>
    %50 = arith.addf %48, %49 : vector<8x32xf32>
    %cst_43 = arith.constant dense<0.000000e+00> : vector<16x32xf32>
    %51 = tpu.matmul %12, %50, %cst_43 {dimension_numbers = #tpu.dot_dimension_numbers<[1], [0], [0], [1], [0, 0, 1, 1], [], []>} : vector<16x8xf32>, vector<8x32xf32>, vector<16x32xf32> -> vector<16x32xf32>
    %52 = vector.broadcast %14 : vector<16x1xf32> to vector<16x32xf32>
    %53 = arith.addf %51, %52 : vector<16x32xf32>
    %cst_44 = arith.constant 5.000000e-01 : f32
    %54 = vector.broadcast %cst_44 : f32 to vector<16x32xf32>
    %55 = arith.mulf %54, %53 : vector<16x32xf32>
    %cst_45 = arith.constant 0.707106769 : f32
    %56 = vector.broadcast %cst_45 : f32 to vector<16x32xf32>
    %57 = arith.mulf %53, %56 : vector<16x32xf32>
    %58 = math.absf %57 : vector<16x32xf32>
    %cst_46 = arith.constant 0.327591091 : f32
    %59 = vector.broadcast %cst_46 : f32 to vector<16x32xf32>
    %60 = arith.mulf %59, %58 : vector<16x32xf32>
    %cst_47 = arith.constant 1.000000e+00 : f32
    %61 = vector.broadcast %cst_47 : f32 to vector<16x32xf32>
    %62 = arith.addf %61, %60 : vector<16x32xf32>
    %cst_48 = arith.constant 1.000000e+00 : f32
    %63 = vector.broadcast %cst_48 : f32 to vector<16x32xf32>
    %64 = arith.divf %63, %62 : vector<16x32xf32>
    %cst_49 = arith.constant 1.06140542 : f32
    %65 = vector.broadcast %cst_49 : f32 to vector<16x32xf32>
    %66 = arith.mulf %65, %64 : vector<16x32xf32>
    %cst_50 = arith.constant -1.45315206 : f32
    %67 = vector.broadcast %cst_50 : f32 to vector<16x32xf32>
    %68 = arith.addf %66, %67 : vector<16x32xf32>
    %69 = arith.mulf %68, %64 : vector<16x32xf32>
    %cst_51 = arith.constant 1.42141378 : f32
    %70 = vector.broadcast %cst_51 : f32 to vector<16x32xf32>
    %71 = arith.addf %69, %70 : vector<16x32xf32>
    %72 = arith.mulf %71, %64 : vector<16x32xf32>
    %cst_52 = arith.constant -0.284496725 : f32
    %73 = vector.broadcast %cst_52 : f32 to vector<16x32xf32>
    %74 = arith.addf %72, %73 : vector<16x32xf32>
    %75 = arith.mulf %74, %64 : vector<16x32xf32>
    %cst_53 = arith.constant 0.254829586 : f32
    %76 = vector.broadcast %cst_53 : f32 to vector<16x32xf32>
    %77 = arith.addf %75, %76 : vector<16x32xf32>
    %78 = arith.mulf %77, %64 : vector<16x32xf32>
    %cst_54 = arith.constant 0.000000e+00 : f32
    %79 = vector.broadcast %cst_54 : f32 to vector<16x32xf32>
    %80 = arith.subf %79, %58 : vector<16x32xf32>
    %81 = arith.mulf %80, %58 : vector<16x32xf32>
    %82 = math.exp %81 : vector<16x32xf32>
    %83 = arith.mulf %78, %82 : vector<16x32xf32>
    %cst_55 = arith.constant 1.000000e+00 : f32
    %84 = vector.broadcast %cst_55 : f32 to vector<16x32xf32>
    %85 = arith.subf %84, %83 : vector<16x32xf32>
    %cst_56 = arith.constant 0.000000e+00 : f32
    %86 = vector.broadcast %cst_56 : f32 to vector<16x32xf32>
    %87 = arith.cmpf oge, %57, %86 : vector<16x32xf32>
    %cst_57 = arith.constant 0.000000e+00 : f32
    %88 = vector.broadcast %cst_57 : f32 to vector<16x32xf32>
    %89 = arith.subf %88, %85 : vector<16x32xf32>
    %90 = arith.select %87, %85, %89 : vector<16x32xi1>, vector<16x32xf32>
    %cst_58 = arith.constant 1.000000e+00 : f32
    %91 = vector.broadcast %cst_58 : f32 to vector<16x32xf32>
    %92 = arith.addf %91, %90 : vector<16x32xf32>
    %93 = arith.mulf %55, %92 : vector<16x32xf32>
    %cst_59 = arith.constant dense<0.000000e+00> : vector<8x32xf32>
    %94 = tpu.matmul %16, %93, %cst_59 {dimension_numbers = #tpu.dot_dimension_numbers<[1], [0], [0], [1], [0, 0, 1, 1], [], []>} : vector<8x16xf32>, vector<16x32xf32>, vector<8x32xf32> -> vector<8x32xf32>
    %95 = vector.broadcast %18 : vector<8x1xf32> to vector<8x32xf32>
    %96 = arith.addf %94, %95 : vector<8x32xf32>
    %97 = arith.addf %28, %96 : vector<8x32xf32>
    %cst_60 = arith.constant dense<0.000000e+00> : vector<8xf32>
    %98 = vector.multi_reduction <add>, %97, %cst_60 [1] : vector<8x32xf32> to vector<8xf32>
    %99 = vector.shape_cast %98 : vector<8xf32> to vector<8x1xf32>
    %cst_61 = arith.constant 3.200000e+01 : f32
    %100 = vector.broadcast %cst_61 : f32 to vector<8x1xf32>
    %101 = arith.divf %99, %100 : vector<8x1xf32>
    %102 = vector.broadcast %101 : vector<8x1xf32> to vector<8x32xf32>
    %103 = arith.subf %97, %102 : vector<8x32xf32>
    %104 = arith.mulf %103, %103 : vector<8x32xf32>
    %cst_62 = arith.constant dense<0.000000e+00> : vector<8xf32>
    %105 = vector.multi_reduction <add>, %104, %cst_62 [1] : vector<8x32xf32> to vector<8xf32>
    %106 = vector.shape_cast %105 : vector<8xf32> to vector<8x1xf32>
    %cst_63 = arith.constant 3.200000e+01 : f32
    %107 = vector.broadcast %cst_63 : f32 to vector<8x1xf32>
    %108 = arith.divf %106, %107 : vector<8x1xf32>
    %109 = vector.broadcast %101 : vector<8x1xf32> to vector<8x32xf32>
    %110 = arith.subf %97, %109 : vector<8x32xf32>
    %cst_64 = arith.constant 9.99999997E-7 : f32
    %111 = vector.broadcast %cst_64 : f32 to vector<8x1xf32>
    %112 = arith.addf %108, %111 : vector<8x1xf32>
    %113 = math.rsqrt %112 : vector<8x1xf32>
    %114 = vector.broadcast %113 : vector<8x1xf32> to vector<8x32xf32>
    %115 = arith.mulf %110, %114 : vector<8x32xf32>
    %116 = vector.broadcast %8 : vector<1x32xf32> to vector<8x32xf32>
    %117 = arith.mulf %115, %116 : vector<8x32xf32>
    %118 = vector.broadcast %10 : vector<1x32xf32> to vector<8x32xf32>
    %119 = arith.addf %117, %118 : vector<8x32xf32>
    %cst_65 = arith.constant dense<0.000000e+00> : vector<8x128xf32>
    %120 = tpu.matmul %119, %20, %cst_65 {dimension_numbers = #tpu.dot_dimension_numbers<[1], [0], [0], [1], [0, 0, 1, 1], [], []>} : vector<8x32xf32>, vector<32x128xf32>, vector<8x128xf32> -> vector<8x128xf32>
    %121 = vector.broadcast %22 : vector<1x128xf32> to vector<8x128xf32>
    %122 = arith.addf %120, %121 : vector<8x128xf32>
    %cst_66 = arith.constant 5.000000e-01 : f32
    %123 = vector.broadcast %cst_66 : f32 to vector<8x128xf32>
    %124 = arith.mulf %123, %122 : vector<8x128xf32>
    %cst_67 = arith.constant 0.707106769 : f32
    %125 = vector.broadcast %cst_67 : f32 to vector<8x128xf32>
    %126 = arith.mulf %122, %125 : vector<8x128xf32>
    %127 = math.absf %126 : vector<8x128xf32>
    %cst_68 = arith.constant 0.327591091 : f32
    %128 = vector.broadcast %cst_68 : f32 to vector<8x128xf32>
    %129 = arith.mulf %128, %127 : vector<8x128xf32>
    %cst_69 = arith.constant 1.000000e+00 : f32
    %130 = vector.broadcast %cst_69 : f32 to vector<8x128xf32>
    %131 = arith.addf %130, %129 : vector<8x128xf32>
    %cst_70 = arith.constant 1.000000e+00 : f32
    %132 = vector.broadcast %cst_70 : f32 to vector<8x128xf32>
    %133 = arith.divf %132, %131 : vector<8x128xf32>
    %cst_71 = arith.constant 1.06140542 : f32
    %134 = vector.broadcast %cst_71 : f32 to vector<8x128xf32>
    %135 = arith.mulf %134, %133 : vector<8x128xf32>
    %cst_72 = arith.constant -1.45315206 : f32
    %136 = vector.broadcast %cst_72 : f32 to vector<8x128xf32>
    %137 = arith.addf %135, %136 : vector<8x128xf32>
    %138 = arith.mulf %137, %133 : vector<8x128xf32>
    %cst_73 = arith.constant 1.42141378 : f32
    %139 = vector.broadcast %cst_73 : f32 to vector<8x128xf32>
    %140 = arith.addf %138, %139 : vector<8x128xf32>
    %141 = arith.mulf %140, %133 : vector<8x128xf32>
    %cst_74 = arith.constant -0.284496725 : f32
    %142 = vector.broadcast %cst_74 : f32 to vector<8x128xf32>
    %143 = arith.addf %141, %142 : vector<8x128xf32>
    %144 = arith.mulf %143, %133 : vector<8x128xf32>
    %cst_75 = arith.constant 0.254829586 : f32
    %145 = vector.broadcast %cst_75 : f32 to vector<8x128xf32>
    %146 = arith.addf %144, %145 : vector<8x128xf32>
    %147 = arith.mulf %146, %133 : vector<8x128xf32>
    %cst_76 = arith.constant 0.000000e+00 : f32
    %148 = vector.broadcast %cst_76 : f32 to vector<8x128xf32>
    %149 = arith.subf %148, %127 : vector<8x128xf32>
    %150 = arith.mulf %149, %127 : vector<8x128xf32>
    %151 = math.exp %150 : vector<8x128xf32>
    %152 = arith.mulf %147, %151 : vector<8x128xf32>
    %cst_77 = arith.constant 1.000000e+00 : f32
    %153 = vector.broadcast %cst_77 : f32 to vector<8x128xf32>
    %154 = arith.subf %153, %152 : vector<8x128xf32>
    %cst_78 = arith.constant 0.000000e+00 : f32
    %155 = vector.broadcast %cst_78 : f32 to vector<8x128xf32>
    %156 = arith.cmpf oge, %126, %155 : vector<8x128xf32>
    %cst_79 = arith.constant 0.000000e+00 : f32
    %157 = vector.broadcast %cst_79 : f32 to vector<8x128xf32>
    %158 = arith.subf %157, %154 : vector<8x128xf32>
    %159 = arith.select %156, %154, %158 : vector<8x128xi1>, vector<8x128xf32>
    %cst_80 = arith.constant 1.000000e+00 : f32
    %160 = vector.broadcast %cst_80 : f32 to vector<8x128xf32>
    %161 = arith.addf %160, %159 : vector<8x128xf32>
    %162 = arith.mulf %124, %161 : vector<8x128xf32>
    %cst_81 = arith.constant dense<0.000000e+00> : vector<8x32xf32>
    %163 = tpu.matmul %162, %24, %cst_81 {dimension_numbers = #tpu.dot_dimension_numbers<[1], [0], [0], [1], [0, 0, 1, 1], [], []>} : vector<8x128xf32>, vector<128x32xf32>, vector<8x32xf32> -> vector<8x32xf32>
    %164 = vector.broadcast %26 : vector<1x32xf32> to vector<8x32xf32>
    %165 = arith.addf %163, %164 : vector<8x32xf32>
    %166 = arith.addf %97, %165 : vector<8x32xf32>
    %c0_82 = arith.constant 0 : index
    %c0_83 = arith.constant 0 : index
    %c0_84 = arith.constant 0 : index
    %167 = vector.load %arg20[%c0_82, %c0_83, %c0_84] : memref<2x8x32xf32, #tpu.memory_space<vmem>>, vector<1x8x32xf32>
    %168 = vector.shape_cast %167 : vector<1x8x32xf32> to vector<8x32xf32>
    %169 = vector.shape_cast %166 : vector<8x32xf32> to vector<1x8x32xf32>
    tpu.vector_store %arg20[%c0_82, %c0_83, %c0_84], %169 {strides = array<i32>} : memref<2x8x32xf32, #tpu.memory_space<vmem>>, vector<1x8x32xf32>,
    %c1 = arith.constant 1 : index
    %c0_85 = arith.constant 0 : index
    %c0_86 = arith.constant 0 : index
    %170 = vector.load %arg20[%c1, %c0_85, %c0_86] : memref<2x8x32xf32, #tpu.memory_space<vmem>>, vector<1x8x32xf32>
    %171 = vector.shape_cast %170 : vector<1x8x32xf32> to vector<8x32xf32>
    %cst_87 = arith.constant dense<0.000000e+00> : vector<8xf32>
    %172 = vector.multi_reduction <add>, %171, %cst_87 [1] : vector<8x32xf32> to vector<8xf32>
    %173 = vector.shape_cast %172 : vector<8xf32> to vector<8x1xf32>
    %cst_88 = arith.constant 3.200000e+01 : f32
    %174 = vector.broadcast %cst_88 : f32 to vector<8x1xf32>
    %175 = arith.divf %173, %174 : vector<8x1xf32>
    %176 = vector.broadcast %175 : vector<8x1xf32> to vector<8x32xf32>
    %177 = arith.subf %171, %176 : vector<8x32xf32>
    %178 = arith.mulf %177, %177 : vector<8x32xf32>
    %cst_89 = arith.constant dense<0.000000e+00> : vector<8xf32>
    %179 = vector.multi_reduction <add>, %178, %cst_89 [1] : vector<8x32xf32> to vector<8xf32>
    %180 = vector.shape_cast %179 : vector<8xf32> to vector<8x1xf32>
    %cst_90 = arith.constant 3.200000e+01 : f32
    %181 = vector.broadcast %cst_90 : f32 to vector<8x1xf32>
    %182 = arith.divf %180, %181 : vector<8x1xf32>
    %183 = vector.broadcast %175 : vector<8x1xf32> to vector<8x32xf32>
    %184 = arith.subf %171, %183 : vector<8x32xf32>
    %cst_91 = arith.constant 9.99999997E-7 : f32
    %185 = vector.broadcast %cst_91 : f32 to vector<8x1xf32>
    %186 = arith.addf %182, %185 : vector<8x1xf32>
    %187 = math.rsqrt %186 : vector<8x1xf32>
    %188 = vector.broadcast %187 : vector<8x1xf32> to vector<8x32xf32>
    %189 = arith.mulf %184, %188 : vector<8x32xf32>
    %190 = vector.broadcast %4 : vector<1x32xf32> to vector<8x32xf32>
    %191 = arith.mulf %189, %190 : vector<8x32xf32>
    %192 = vector.broadcast %6 : vector<1x32xf32> to vector<8x32xf32>
    %193 = arith.addf %191, %192 : vector<8x32xf32>
    %cst_92 = arith.constant dense<0.000000e+00> : vector<16x32xf32>
    %194 = tpu.matmul %12, %193, %cst_92 {dimension_numbers = #tpu.dot_dimension_numbers<[1], [0], [0], [1], [0, 0, 1, 1], [], []>} : vector<16x8xf32>, vector<8x32xf32>, vector<16x32xf32> -> vector<16x32xf32>
    %195 = vector.broadcast %14 : vector<16x1xf32> to vector<16x32xf32>
    %196 = arith.addf %194, %195 : vector<16x32xf32>
    %cst_93 = arith.constant 5.000000e-01 : f32
    %197 = vector.broadcast %cst_93 : f32 to vector<16x32xf32>
    %198 = arith.mulf %197, %196 : vector<16x32xf32>
    %cst_94 = arith.constant 0.707106769 : f32
    %199 = vector.broadcast %cst_94 : f32 to vector<16x32xf32>
    %200 = arith.mulf %196, %199 : vector<16x32xf32>
    %201 = math.absf %200 : vector<16x32xf32>
    %cst_95 = arith.constant 0.327591091 : f32
    %202 = vector.broadcast %cst_95 : f32 to vector<16x32xf32>
    %203 = arith.mulf %202, %201 : vector<16x32xf32>
    %cst_96 = arith.constant 1.000000e+00 : f32
    %204 = vector.broadcast %cst_96 : f32 to vector<16x32xf32>
    %205 = arith.addf %204, %203 : vector<16x32xf32>
    %cst_97 = arith.constant 1.000000e+00 : f32
    %206 = vector.broadcast %cst_97 : f32 to vector<16x32xf32>
    %207 = arith.divf %206, %205 : vector<16x32xf32>
    %cst_98 = arith.constant 1.06140542 : f32
    %208 = vector.broadcast %cst_98 : f32 to vector<16x32xf32>
    %209 = arith.mulf %208, %207 : vector<16x32xf32>
    %cst_99 = arith.constant -1.45315206 : f32
    %210 = vector.broadcast %cst_99 : f32 to vector<16x32xf32>
    %211 = arith.addf %209, %210 : vector<16x32xf32>
    %212 = arith.mulf %211, %207 : vector<16x32xf32>
    %cst_100 = arith.constant 1.42141378 : f32
    %213 = vector.broadcast %cst_100 : f32 to vector<16x32xf32>
    %214 = arith.addf %212, %213 : vector<16x32xf32>
    %215 = arith.mulf %214, %207 : vector<16x32xf32>
    %cst_101 = arith.constant -0.284496725 : f32
    %216 = vector.broadcast %cst_101 : f32 to vector<16x32xf32>
    %217 = arith.addf %215, %216 : vector<16x32xf32>
    %218 = arith.mulf %217, %207 : vector<16x32xf32>
    %cst_102 = arith.constant 0.254829586 : f32
    %219 = vector.broadcast %cst_102 : f32 to vector<16x32xf32>
    %220 = arith.addf %218, %219 : vector<16x32xf32>
    %221 = arith.mulf %220, %207 : vector<16x32xf32>
    %cst_103 = arith.constant 0.000000e+00 : f32
    %222 = vector.broadcast %cst_103 : f32 to vector<16x32xf32>
    %223 = arith.subf %222, %201 : vector<16x32xf32>
    %224 = arith.mulf %223, %201 : vector<16x32xf32>
    %225 = math.exp %224 : vector<16x32xf32>
    %226 = arith.mulf %221, %225 : vector<16x32xf32>
    %cst_104 = arith.constant 1.000000e+00 : f32
    %227 = vector.broadcast %cst_104 : f32 to vector<16x32xf32>
    %228 = arith.subf %227, %226 : vector<16x32xf32>
    %cst_105 = arith.constant 0.000000e+00 : f32
    %229 = vector.broadcast %cst_105 : f32 to vector<16x32xf32>
    %230 = arith.cmpf oge, %200, %229 : vector<16x32xf32>
    %cst_106 = arith.constant 0.000000e+00 : f32
    %231 = vector.broadcast %cst_106 : f32 to vector<16x32xf32>
    %232 = arith.subf %231, %228 : vector<16x32xf32>
    %233 = arith.select %230, %228, %232 : vector<16x32xi1>, vector<16x32xf32>
    %cst_107 = arith.constant 1.000000e+00 : f32
    %234 = vector.broadcast %cst_107 : f32 to vector<16x32xf32>
    %235 = arith.addf %234, %233 : vector<16x32xf32>
    %236 = arith.mulf %198, %235 : vector<16x32xf32>
    %cst_108 = arith.constant dense<0.000000e+00> : vector<8x32xf32>
    %237 = tpu.matmul %16, %236, %cst_108 {dimension_numbers = #tpu.dot_dimension_numbers<[1], [0], [0], [1], [0, 0, 1, 1], [], []>} : vector<8x16xf32>, vector<16x32xf32>, vector<8x32xf32> -> vector<8x32xf32>
    %238 = vector.broadcast %18 : vector<8x1xf32> to vector<8x32xf32>
    %239 = arith.addf %237, %238 : vector<8x32xf32>
    %240 = arith.addf %171, %239 : vector<8x32xf32>
    %cst_109 = arith.constant dense<0.000000e+00> : vector<8xf32>
    %241 = vector.multi_reduction <add>, %240, %cst_109 [1] : vector<8x32xf32> to vector<8xf32>
    %242 = vector.shape_cast %241 : vector<8xf32> to vector<8x1xf32>
    %cst_110 = arith.constant 3.200000e+01 : f32
    %243 = vector.broadcast %cst_110 : f32 to vector<8x1xf32>
    %244 = arith.divf %242, %243 : vector<8x1xf32>
    %245 = vector.broadcast %244 : vector<8x1xf32> to vector<8x32xf32>
    %246 = arith.subf %240, %245 : vector<8x32xf32>
    %247 = arith.mulf %246, %246 : vector<8x32xf32>
    %cst_111 = arith.constant dense<0.000000e+00> : vector<8xf32>
    %248 = vector.multi_reduction <add>, %247, %cst_111 [1] : vector<8x32xf32> to vector<8xf32>
    %249 = vector.shape_cast %248 : vector<8xf32> to vector<8x1xf32>
    %cst_112 = arith.constant 3.200000e+01 : f32
    %250 = vector.broadcast %cst_112 : f32 to vector<8x1xf32>
    %251 = arith.divf %249, %250 : vector<8x1xf32>
    %252 = vector.broadcast %244 : vector<8x1xf32> to vector<8x32xf32>
    %253 = arith.subf %240, %252 : vector<8x32xf32>
    %cst_113 = arith.constant 9.99999997E-7 : f32
    %254 = vector.broadcast %cst_113 : f32 to vector<8x1xf32>
    %255 = arith.addf %251, %254 : vector<8x1xf32>
    %256 = math.rsqrt %255 : vector<8x1xf32>
    %257 = vector.broadcast %256 : vector<8x1xf32> to vector<8x32xf32>
    %258 = arith.mulf %253, %257 : vector<8x32xf32>
    %259 = vector.broadcast %8 : vector<1x32xf32> to vector<8x32xf32>
    %260 = arith.mulf %258, %259 : vector<8x32xf32>
    %261 = vector.broadcast %10 : vector<1x32xf32> to vector<8x32xf32>
    %262 = arith.addf %260, %261 : vector<8x32xf32>
    %cst_114 = arith.constant dense<0.000000e+00> : vector<8x128xf32>
    %263 = tpu.matmul %262, %20, %cst_114 {dimension_numbers = #tpu.dot_dimension_numbers<[1], [0], [0], [1], [0, 0, 1, 1], [], []>} : vector<8x32xf32>, vector<32x128xf32>, vector<8x128xf32> -> vector<8x128xf32>
    %264 = vector.broadcast %22 : vector<1x128xf32> to vector<8x128xf32>
    %265 = arith.addf %263, %264 : vector<8x128xf32>
    %cst_115 = arith.constant 5.000000e-01 : f32
    %266 = vector.broadcast %cst_115 : f32 to vector<8x128xf32>
    %267 = arith.mulf %266, %265 : vector<8x128xf32>
    %cst_116 = arith.constant 0.707106769 : f32
    %268 = vector.broadcast %cst_116 : f32 to vector<8x128xf32>
    %269 = arith.mulf %265, %268 : vector<8x128xf32>
    %270 = math.absf %269 : vector<8x128xf32>
    %cst_117 = arith.constant 0.327591091 : f32
    %271 = vector.broadcast %cst_117 : f32 to vector<8x128xf32>
    %272 = arith.mulf %271, %270 : vector<8x128xf32>
    %cst_118 = arith.constant 1.000000e+00 : f32
    %273 = vector.broadcast %cst_118 : f32 to vector<8x128xf32>
    %274 = arith.addf %273, %272 : vector<8x128xf32>
    %cst_119 = arith.constant 1.000000e+00 : f32
    %275 = vector.broadcast %cst_119 : f32 to vector<8x128xf32>
    %276 = arith.divf %275, %274 : vector<8x128xf32>
    %cst_120 = arith.constant 1.06140542 : f32
    %277 = vector.broadcast %cst_120 : f32 to vector<8x128xf32>
    %278 = arith.mulf %277, %276 : vector<8x128xf32>
    %cst_121 = arith.constant -1.45315206 : f32
    %279 = vector.broadcast %cst_121 : f32 to vector<8x128xf32>
    %280 = arith.addf %278, %279 : vector<8x128xf32>
    %281 = arith.mulf %280, %276 : vector<8x128xf32>
    %cst_122 = arith.constant 1.42141378 : f32
    %282 = vector.broadcast %cst_122 : f32 to vector<8x128xf32>
    %283 = arith.addf %281, %282 : vector<8x128xf32>
    %284 = arith.mulf %283, %276 : vector<8x128xf32>
    %cst_123 = arith.constant -0.284496725 : f32
    %285 = vector.broadcast %cst_123 : f32 to vector<8x128xf32>
    %286 = arith.addf %284, %285 : vector<8x128xf32>
    %287 = arith.mulf %286, %276 : vector<8x128xf32>
    %cst_124 = arith.constant 0.254829586 : f32
    %288 = vector.broadcast %cst_124 : f32 to vector<8x128xf32>
    %289 = arith.addf %287, %288 : vector<8x128xf32>
    %290 = arith.mulf %289, %276 : vector<8x128xf32>
    %cst_125 = arith.constant 0.000000e+00 : f32
    %291 = vector.broadcast %cst_125 : f32 to vector<8x128xf32>
    %292 = arith.subf %291, %270 : vector<8x128xf32>
    %293 = arith.mulf %292, %270 : vector<8x128xf32>
    %294 = math.exp %293 : vector<8x128xf32>
    %295 = arith.mulf %290, %294 : vector<8x128xf32>
    %cst_126 = arith.constant 1.000000e+00 : f32
    %296 = vector.broadcast %cst_126 : f32 to vector<8x128xf32>
    %297 = arith.subf %296, %295 : vector<8x128xf32>
    %cst_127 = arith.constant 0.000000e+00 : f32
    %298 = vector.broadcast %cst_127 : f32 to vector<8x128xf32>
    %299 = arith.cmpf oge, %269, %298 : vector<8x128xf32>
    %cst_128 = arith.constant 0.000000e+00 : f32
    %300 = vector.broadcast %cst_128 : f32 to vector<8x128xf32>
    %301 = arith.subf %300, %297 : vector<8x128xf32>
    %302 = arith.select %299, %297, %301 : vector<8x128xi1>, vector<8x128xf32>
    %cst_129 = arith.constant 1.000000e+00 : f32
    %303 = vector.broadcast %cst_129 : f32 to vector<8x128xf32>
    %304 = arith.addf %303, %302 : vector<8x128xf32>
    %305 = arith.mulf %267, %304 : vector<8x128xf32>
    %cst_130 = arith.constant dense<0.000000e+00> : vector<8x32xf32>
    %306 = tpu.matmul %305, %24, %cst_130 {dimension_numbers = #tpu.dot_dimension_numbers<[1], [0], [0], [1], [0, 0, 1, 1], [], []>} : vector<8x128xf32>, vector<128x32xf32>, vector<8x32xf32> -> vector<8x32xf32>
    %307 = vector.broadcast %26 : vector<1x32xf32> to vector<8x32xf32>
    %308 = arith.addf %306, %307 : vector<8x32xf32>
    %309 = arith.addf %240, %308 : vector<8x32xf32>
    %c1_131 = arith.constant 1 : index
    %c0_132 = arith.constant 0 : index
    %c0_133 = arith.constant 0 : index
    %310 = vector.load %arg20[%c1_131, %c0_132, %c0_133] : memref<2x8x32xf32, #tpu.memory_space<vmem>>, vector<1x8x32xf32>
    %311 = vector.shape_cast %310 : vector<1x8x32xf32> to vector<8x32xf32>
    %312 = vector.shape_cast %309 : vector<8x32xf32> to vector<1x8x32xf32>
    tpu.vector_store %arg20[%c1_131, %c0_132, %c0_133], %312 {strides = array<i32>} : memref<2x8x32xf32, #tpu.memory_space<vmem>>, vector<1x8x32xf32>,
    %c1_i32 = arith.constant 1 : i32
    %313 = arith.cmpi eq, %arg1, %c1_i32 : i32
    %314 = arith.extui %313 : i1 to i32
    %c0_i32_134 = arith.constant 0 : i32
    %315 = arith.cmpi ne, %314, %c0_i32_134 : i32
    scf.if %315 {
      %c0_135 = arith.constant 0 : index
      %c0_136 = arith.constant 0 : index
      %316 = vector.load %arg15[%c0_135, %c0_136] : memref<1x32xf32, #tpu.memory_space<vmem>>, vector<1x32xf32>
      %c0_137 = arith.constant 0 : index
      %c0_138 = arith.constant 0 : index
      %317 = vector.load %arg16[%c0_137, %c0_138] : memref<1x32xf32, #tpu.memory_space<vmem>>, vector<1x32xf32>
      %c0_139 = arith.constant 0 : index
      %c0_140 = arith.constant 0 : index
      %318 = vector.load %arg17[%c0_139, %c0_140] : memref<32x3xf32, #tpu.memory_space<vmem>>, vector<32x3xf32>
      %c0_141 = arith.constant 0 : index
      %c0_142 = arith.constant 0 : index
      %319 = vector.load %arg18[%c0_141, %c0_142] : memref<1x3xf32, #tpu.memory_space<vmem>>, vector<1x3xf32>
      %c0_143 = arith.constant 0 : index
      %c0_144 = arith.constant 0 : index
      %c0_145 = arith.constant 0 : index
      %320 = vector.load %arg20[%c0_143, %c0_144, %c0_145] : memref<2x8x32xf32, #tpu.memory_space<vmem>>, vector<1x8x32xf32>
      %321 = vector.shape_cast %320 : vector<1x8x32xf32> to vector<8x32xf32>
      %cst_146 = arith.constant dense<0.000000e+00> : vector<8xf32>
      %322 = vector.multi_reduction <add>, %321, %cst_146 [1] : vector<8x32xf32> to vector<8xf32>
      %323 = vector.shape_cast %322 : vector<8xf32> to vector<8x1xf32>
      %cst_147 = arith.constant 3.200000e+01 : f32
      %324 = vector.broadcast %cst_147 : f32 to vector<8x1xf32>
      %325 = arith.divf %323, %324 : vector<8x1xf32>
      %326 = vector.broadcast %325 : vector<8x1xf32> to vector<8x32xf32>
      %327 = arith.subf %321, %326 : vector<8x32xf32>
      %328 = arith.mulf %327, %327 : vector<8x32xf32>
      %cst_148 = arith.constant dense<0.000000e+00> : vector<8xf32>
      %329 = vector.multi_reduction <add>, %328, %cst_148 [1] : vector<8x32xf32> to vector<8xf32>
      %330 = vector.shape_cast %329 : vector<8xf32> to vector<8x1xf32>
      %cst_149 = arith.constant 3.200000e+01 : f32
      %331 = vector.broadcast %cst_149 : f32 to vector<8x1xf32>
      %332 = arith.divf %330, %331 : vector<8x1xf32>
      %333 = vector.broadcast %325 : vector<8x1xf32> to vector<8x32xf32>
      %334 = arith.subf %321, %333 : vector<8x32xf32>
      %cst_150 = arith.constant 9.99999997E-7 : f32
      %335 = vector.broadcast %cst_150 : f32 to vector<8x1xf32>
      %336 = arith.addf %332, %335 : vector<8x1xf32>
      %337 = math.rsqrt %336 : vector<8x1xf32>
      %338 = vector.broadcast %337 : vector<8x1xf32> to vector<8x32xf32>
      %339 = arith.mulf %334, %338 : vector<8x32xf32>
      %340 = vector.broadcast %316 : vector<1x32xf32> to vector<8x32xf32>
      %341 = arith.mulf %339, %340 : vector<8x32xf32>
      %342 = vector.broadcast %317 : vector<1x32xf32> to vector<8x32xf32>
      %343 = arith.addf %341, %342 : vector<8x32xf32>
      %cst_151 = arith.constant dense<0.000000e+00> : vector<32xf32>
      %344 = vector.multi_reduction <add>, %343, %cst_151 [0] : vector<8x32xf32> to vector<32xf32>
      %345 = vector.shape_cast %344 : vector<32xf32> to vector<1x32xf32>
      %cst_152 = arith.constant 8.000000e+00 : f32
      %346 = vector.broadcast %cst_152 : f32 to vector<1x32xf32>
      %347 = arith.divf %345, %346 : vector<1x32xf32>
      %cst_153 = arith.constant dense<0.000000e+00> : vector<1x3xf32>
      %348 = tpu.matmul %347, %318, %cst_153 {dimension_numbers = #tpu.dot_dimension_numbers<[1], [0], [0], [1], [0, 0, 1, 1], [], []>} : vector<1x32xf32>, vector<32x3xf32>, vector<1x3xf32> -> vector<1x3xf32>
      %349 = arith.addf %348, %319 : vector<1x3xf32>
      %c0_154 = arith.constant 0 : index
      %c0_155 = arith.constant 0 : index
      %c0_156 = arith.constant 0 : index
      %350 = vector.load %arg19[%c0_154, %c0_155, %c0_156] : memref<2x1x3xf32, #tpu.memory_space<vmem>>, vector<1x1x3xf32>
      %351 = vector.shape_cast %350 : vector<1x1x3xf32> to vector<1x3xf32>
      %352 = vector.shape_cast %349 : vector<1x3xf32> to vector<1x1x3xf32>
      tpu.vector_store %arg19[%c0_154, %c0_155, %c0_156], %352 {strides = array<i32>} : memref<2x1x3xf32, #tpu.memory_space<vmem>>, vector<1x1x3xf32>,
      %c1_157 = arith.constant 1 : index
      %c0_158 = arith.constant 0 : index
      %c0_159 = arith.constant 0 : index
      %353 = vector.load %arg20[%c1_157, %c0_158, %c0_159] : memref<2x8x32xf32, #tpu.memory_space<vmem>>, vector<1x8x32xf32>
      %354 = vector.shape_cast %353 : vector<1x8x32xf32> to vector<8x32xf32>
      %cst_160 = arith.constant dense<0.000000e+00> : vector<8xf32>
      %355 = vector.multi_reduction <add>, %354, %cst_160 [1] : vector<8x32xf32> to vector<8xf32>
      %356 = vector.shape_cast %355 : vector<8xf32> to vector<8x1xf32>
      %cst_161 = arith.constant 3.200000e+01 : f32
      %357 = vector.broadcast %cst_161 : f32 to vector<8x1xf32>
      %358 = arith.divf %356, %357 : vector<8x1xf32>
      %359 = vector.broadcast %358 : vector<8x1xf32> to vector<8x32xf32>
      %360 = arith.subf %354, %359 : vector<8x32xf32>
      %361 = arith.mulf %360, %360 : vector<8x32xf32>
      %cst_162 = arith.constant dense<0.000000e+00> : vector<8xf32>
      %362 = vector.multi_reduction <add>, %361, %cst_162 [1] : vector<8x32xf32> to vector<8xf32>
      %363 = vector.shape_cast %362 : vector<8xf32> to vector<8x1xf32>
      %cst_163 = arith.constant 3.200000e+01 : f32
      %364 = vector.broadcast %cst_163 : f32 to vector<8x1xf32>
      %365 = arith.divf %363, %364 : vector<8x1xf32>
      %366 = vector.broadcast %358 : vector<8x1xf32> to vector<8x32xf32>
      %367 = arith.subf %354, %366 : vector<8x32xf32>
      %cst_164 = arith.constant 9.99999997E-7 : f32
      %368 = vector.broadcast %cst_164 : f32 to vector<8x1xf32>
      %369 = arith.addf %365, %368 : vector<8x1xf32>
      %370 = math.rsqrt %369 : vector<8x1xf32>
      %371 = vector.broadcast %370 : vector<8x1xf32> to vector<8x32xf32>
      %372 = arith.mulf %367, %371 : vector<8x32xf32>
      %373 = vector.broadcast %316 : vector<1x32xf32> to vector<8x32xf32>
      %374 = arith.mulf %372, %373 : vector<8x32xf32>
      %375 = vector.broadcast %317 : vector<1x32xf32> to vector<8x32xf32>
      %376 = arith.addf %374, %375 : vector<8x32xf32>
      %cst_165 = arith.constant dense<0.000000e+00> : vector<32xf32>
      %377 = vector.multi_reduction <add>, %376, %cst_165 [0] : vector<8x32xf32> to vector<32xf32>
      %378 = vector.shape_cast %377 : vector<32xf32> to vector<1x32xf32>
      %cst_166 = arith.constant 8.000000e+00 : f32
      %379 = vector.broadcast %cst_166 : f32 to vector<1x32xf32>
      %380 = arith.divf %378, %379 : vector<1x32xf32>
      %cst_167 = arith.constant dense<0.000000e+00> : vector<1x3xf32>
      %381 = tpu.matmul %380, %318, %cst_167 {dimension_numbers = #tpu.dot_dimension_numbers<[1], [0], [0], [1], [0, 0, 1, 1], [], []>} : vector<1x32xf32>, vector<32x3xf32>, vector<1x3xf32> -> vector<1x3xf32>
      %382 = arith.addf %381, %319 : vector<1x3xf32>
      %c1_168 = arith.constant 1 : index
      %c0_169 = arith.constant 0 : index
      %c0_170 = arith.constant 0 : index
      %383 = vector.load %arg19[%c1_168, %c0_169, %c0_170] : memref<2x1x3xf32, #tpu.memory_space<vmem>>, vector<1x1x3xf32>
      %384 = vector.shape_cast %383 : vector<1x1x3xf32> to vector<1x3xf32>
      %385 = vector.shape_cast %382 : vector<1x3xf32> to vector<1x1x3xf32>
      tpu.vector_store %arg19[%c1_168, %c0_169, %c0_170], %385 {strides = array<i32>} : memref<2x1x3xf32, #tpu.memory_space<vmem>>, vector<1x1x3xf32>,
    } else {
    }
    return
  }
  func.func @transform_0(%arg0: i32, %arg1: i32) -> (i32, i32, i32) {
    %c0_i32 = arith.constant 0 : i32
    %c0_i32_0 = arith.constant 0 : i32
    %c0_i32_1 = arith.constant 0 : i32
    return %arg0, %c0_i32, %c0_i32_0 : i32, i32, i32
  }
  func.func @transform_1(%arg0: i32, %arg1: i32) -> (i32, i32, i32) {
    %c0_i32 = arith.constant 0 : i32
    %c0_i32_0 = arith.constant 0 : i32
    %c0_i32_1 = arith.constant 0 : i32
    return %arg1, %c0_i32, %c0_i32_0 : i32, i32, i32
  }
  func.func @transform_2(%arg0: i32, %arg1: i32) -> (i32, i32, i32) {
    %c0_i32 = arith.constant 0 : i32
    %c0_i32_0 = arith.constant 0 : i32
    %c0_i32_1 = arith.constant 0 : i32
    return %arg1, %c0_i32, %c0_i32_0 : i32, i32, i32
  }
  func.func @transform_3(%arg0: i32, %arg1: i32) -> (i32, i32, i32) {
    %c0_i32 = arith.constant 0 : i32
    %c0_i32_0 = arith.constant 0 : i32
    %c0_i32_1 = arith.constant 0 : i32
    return %arg1, %c0_i32, %c0_i32_0 : i32, i32, i32
  }
  func.func @transform_4(%arg0: i32, %arg1: i32) -> (i32, i32, i32) {
    %c0_i32 = arith.constant 0 : i32
    %c0_i32_0 = arith.constant 0 : i32
    %c0_i32_1 = arith.constant 0 : i32
    return %arg1, %c0_i32, %c0_i32_0 : i32, i32, i32
  }
  func.func @transform_5(%arg0: i32, %arg1: i32) -> (i32, i32, i32) {
    %c0_i32 = arith.constant 0 : i32
    %c0_i32_0 = arith.constant 0 : i32
    %c0_i32_1 = arith.constant 0 : i32
    return %arg1, %c0_i32, %c0_i32_0 : i32, i32, i32
  }
  func.func @transform_6(%arg0: i32, %arg1: i32) -> (i32, i32, i32) {
    %c0_i32 = arith.constant 0 : i32
    %c0_i32_0 = arith.constant 0 : i32
    %c0_i32_1 = arith.constant 0 : i32
    return %arg1, %c0_i32, %c0_i32_0 : i32, i32, i32
  }
  func.func @transform_7(%arg0: i32, %arg1: i32) -> (i32, i32, i32) {
    %c0_i32 = arith.constant 0 : i32
    %c0_i32_0 = arith.constant 0 : i32
    %c0_i32_1 = arith.constant 0 : i32
    return %arg1, %c0_i32, %c0_i32_0 : i32, i32, i32
  }
  func.func @transform_8(%arg0: i32, %arg1: i32) -> (i32, i32, i32) {
    %c0_i32 = arith.constant 0 : i32
    %c0_i32_0 = arith.constant 0 : i32
    %c0_i32_1 = arith.constant 0 : i32
    return %arg1, %c0_i32, %c0_i32_0 : i32, i32, i32
  }
  func.func @transform_9(%arg0: i32, %arg1: i32) -> (i32, i32, i32) {
    %c0_i32 = arith.constant 0 : i32
    %c0_i32_0 = arith.constant 0 : i32
    %c0_i32_1 = arith.constant 0 : i32
    return %arg1, %c0_i32, %c0_i32_0 : i32, i32, i32
  }
  func.func @transform_10(%arg0: i32, %arg1: i32) -> (i32, i32, i32) {
    %c0_i32 = arith.constant 0 : i32
    %c0_i32_0 = arith.constant 0 : i32
    %c0_i32_1 = arith.constant 0 : i32
    return %arg1, %c0_i32, %c0_i32_0 : i32, i32, i32
  }
  func.func @transform_11(%arg0: i32, %arg1: i32) -> (i32, i32, i32) {
    %c0_i32 = arith.constant 0 : i32
    %c0_i32_0 = arith.constant 0 : i32
    %c0_i32_1 = arith.constant 0 : i32
    return %arg1, %c0_i32, %c0_i32_0 : i32, i32, i32
  }
  func.func @transform_12(%arg0: i32, %arg1: i32) -> (i32, i32, i32) {
    %c0_i32 = arith.constant 0 : i32
    %c0_i32_0 = arith.constant 0 : i32
    %c0_i32_1 = arith.constant 0 : i32
    return %arg1, %c0_i32, %c0_i32_0 : i32, i32, i32
  }
  func.func @transform_13(%arg0: i32, %arg1: i32) -> (i32, i32) {
    %c0_i32 = arith.constant 0 : i32
    %c0_i32_0 = arith.constant 0 : i32
    %c0_i32_1 = arith.constant 0 : i32
    return %c0_i32, %c0_i32_0 : i32, i32
  }
  func.func @transform_14(%arg0: i32, %arg1: i32) -> (i32, i32) {
    %c0_i32 = arith.constant 0 : i32
    %c0_i32_0 = arith.constant 0 : i32
    %c0_i32_1 = arith.constant 0 : i32
    return %c0_i32, %c0_i32_0 : i32, i32
  }
  func.func @transform_15(%arg0: i32, %arg1: i32) -> (i32, i32) {
    %c0_i32 = arith.constant 0 : i32
    %c0_i32_0 = arith.constant 0 : i32
    %c0_i32_1 = arith.constant 0 : i32
    return %c0_i32, %c0_i32_0 : i32, i32
  }
  func.func @transform_16(%arg0: i32, %arg1: i32) -> (i32, i32) {
    %c0_i32 = arith.constant 0 : i32
    %c0_i32_0 = arith.constant 0 : i32
    %c0_i32_1 = arith.constant 0 : i32
    return %c0_i32, %c0_i32_0 : i32, i32
  }
  func.func @transform_17(%arg0: i32, %arg1: i32) -> (i32, i32, i32) {
    %c0_i32 = arith.constant 0 : i32
    %c0_i32_0 = arith.constant 0 : i32
    %c0_i32_1 = arith.constant 0 : i32
    return %arg0, %c0_i32, %c0_i32_0 : i32, i32, i32
  }
}

</mosaic_0001>

<bundles_post_ra>
// kernel: tpu_custom_call.1
= control target key start
LH: loop header
LB: loop body
LE: loop exit
PB: predicated region body
PF: predicated region fallthrough
CT: control target
= control target key end

     0   :  { %s2879_s0 = inlined_call_operand.vmem [shape: f32[2,8,32], index: 0, kind: input, shape index: {}]   ;;  %s2880_s1 = inlined_call_operand.vmem [shape: f32[2,1,32], index: 1, kind: input, shape index: {}]   ;;  %s2881_s2 = inlined_call_operand.vmem [shape: f32[2,1,32], index: 2, kind: input, shape index: {}]   ;;  %s2882_s3 = inlined_call_operand.vmem [shape: f32[2,16,8], index: 3, kind: input, shape index: {}]   ;;  %s2883_s4 = inlined_call_operand.vmem [shape: f32[2,16,1], index: 4, kind: input, shape index: {}]   ;;  %s2884_s5 = inlined_call_operand.vmem [shape: f32[2,8,16], index: 5, kind: input, shape index: {}]   ;;  %s2885_s6 = inlined_call_operand.vmem [shape: f32[2,8,1], index: 6, kind: input, shape index: {}]   ;;  %s2886_s7 = inlined_call_operand.vmem [shape: f32[2,1,32], index: 7, kind: input, shape index: {}]   ;;  %s2887_s8 = inlined_call_operand.vmem [shape: f32[2,1,32], index: 8, kind: input, shape index: {}]   ;;  %s2888_s9 = inlined_call_operand.vmem [shape: f32[2,32,128], index: 9, kind: input, shape index: {}]   ;;  %s2889_s10 = inlined_call_operand.vmem [shape: f32[2,1,128], index: 10, kind: input, shape index: {}]   ;;  %s2890_s11 = inlined_call_operand.vmem [shape: f32[2,128,32], index: 11, kind: input, shape index: {}]   ;;  %s2891_s12 = inlined_call_operand.vmem [shape: f32[2,1,32], index: 12, kind: input, shape index: {}]   ;;  %s2892_s13 = inlined_call_operand.vmem [shape: f32[1,32], index: 13, kind: input, shape index: {}]   ;;  %s2893_s14 = inlined_call_operand.vmem [shape: f32[1,32], index: 14, kind: input, shape index: {}]   ;;  %s2894_s15 = inlined_call_operand.vmem [shape: f32[32,3], index: 15, kind: input, shape index: {}]   ;;  %s2895_s16 = inlined_call_operand.vmem [shape: f32[1,3], index: 16, kind: input, shape index: {}]   ;;  %s2896_s17 = inlined_call_operand.hbm [shape: f32[2,1,3], index: 17, kind: output, shape index: {}]  }
   0x1   :  { %2900 = sst [smem:[#allocation9_spill]] %s2879_s0 }
   0x2   :  { %2901 = sst [smem:[#allocation10_spill]] %s2880_s1 }
   0x3   :  { %2902 = sst [smem:[#allocation11_spill]] %s2882_s3 }
   0x4   :  { %2903 = sst [smem:[#allocation12_spill]] %s2883_s4 }
   0x5   :  { %2904 = sst [smem:[#allocation13_spill]] %s2884_s5 }
   0x6   :  { %2905 = sst [smem:[#allocation14_spill]] %s2892_s13 }
   0x7   :  { %2906 = sst [smem:[#allocation15_spill]] %s2893_s14 }
   0x8   :  { %2907 = sst [smem:[#allocation16_spill]] %s2895_s16 }
   0x9   :  { %2908 = sst [smem:[#allocation17_spill]] %s2896_s17 }
   0xa   :  { %22 = vsyncpa [#allocation4], 0  ;;  %s2551_s24 = smov 0   ;;  %s2553_s25 = smov 0  }
   0xb   :  { %s2555_s26 = smov 0  }
   0xc LB: > { %2909 = sst [smem:[#allocation6_spill]] %s2447_s25  ;;  %s37_s28 = sadd.s32 1, %s2447_s25  ;;  %s2451_s26 = sphi %s2555_s26, %s28_s26   ;;  %s2447_s25 = sphi %s2553_s25, %s2930_s25   ;;  %s2443_s24 = sphi %s2551_s24, %s2929_s24  }
   0xd   : > { %2910 = sst [smem:[#allocation7_spill]] %s2451_s26  ;;  %p38_p0 = scmp.ge.s32.totalorder %s37_s28, 2 }
   0xe   : > { %p2082_p1 = scmp.ge.s32.totalorder %s2451_s26, 1  ;;  %p607_p2 = scmp.lt.s32.totalorder %s2451_s26, 3 }
   0xf   : > { %s2932_s28 = smov (%p38_p0, %s37_s28), 0 }
  0x10   : > { %2911 = sst [smem:[#allocation8_spill]] %s2932_s28  ;;  %p608_p3 = pnand %p2082_p1, %p607_p2 }
  0x11   : > { %p706_p4 = scmp.lt.s32.totalorder (!%p608_p3), %s2443_s24, 1  ;;  %s2913_s3 = sld [smem:[#allocation11_spill]] (!%p608_p3) }
  0x12   : > { %611 = sbr.rel (%p608_p3) target bundleno = 2110 (0x83e), region = 88  ;;  %s2914_s4 = sld [smem:[#allocation12_spill]] (!%p608_p3) }
  0x13   : > { %s2915_s5 = sld [smem:[#allocation13_spill]] (!%p608_p3)  ;;  %p2093_p5 = scmp.ne.s32.totalorder (!%p608_p3), %s2443_s24, 0 }
  0x17   : > { %s2574_s29 = scalar_select %p706_p4, %s2443_s24, 1 }
  0x18   : > { %s2916_s30 = sld [smem:[#allocation9_spill]] (!%p2093_p5) }
  0x19   : > { %s2117_s22 = sshll.u32 %s2574_s29, 4  ;;  %s2087_s23 = sshll.u32 %s2574_s29, 3 }
  0x1a   : > { %s2589_s0 = scalar_lea.vmem %s2913_s3, %s2117_s22  ;;  %s2594_s17 = scalar_lea.vmem %s2914_s4, %s2117_s22 }
  0x1b   : > { %s2599_s18 = scalar_lea.vmem %s2915_s5, %s2087_s23  ;;  %s2604_s20 = scalar_lea.vmem %s2885_s6, %s2087_s23 }
  0x1c   : > { %s735_s25 = scalar_lea.vmem %s2887_s8, %s2574_s29  ;;  %s2119_s22 = sshll.u32 %s2574_s29, 5 }
  0x1d   : > { %s743_s16 = scalar_lea.vmem %s2889_s10, %s2574_s29  ;;  %s2622_s13 = scalar_lea.vmem %s2888_s9, %s2119_s22 }
  0x1e   : > { %s2120_s19 = sshll.u32 %s2574_s29, 7  ;;  %s751_s3 = scalar_lea.vmem %s2891_s12, %s2574_s29 }
  0x1f   : > { %s2628_s14 = scalar_lea.vmem %s2890_s11, %s2120_s19  ;;  %756 = sbr.rel (%p2093_p5) target bundleno = 38 (0x26), region = 92 }
  0x24   : > { %v757_v0 = vld [vmem:[%s2916_s30] sm:$0xff]  ;;  %vm759_vm0 = vcmask 261120   ;;  %v758_v1 = vld [vmem:[%s2916_s30 + $0x8] sm:$0xff] }
  0x25   : > { %760 = vst.msk [vmem:[#allocation2] sm:$0xff] %vm759_vm0, %v757_v0  ;;  %761 = vst.msk [vmem:[#allocation2 + $0x8] sm:$0xff] %vm759_vm0, %v758_v1 }
  0x26 PF: > { %vm795_vm1 = vcmask 261120   ;;  %v766_v16 = vld [vmem:[%s2589_s0] sm:$0xff]  ;;  %vm834_vm2 = vcmask 64512   ;;  %v769_v18 = vld [vmem:[%s2594_s17 + $0x8] sm:$0xff]  ;;  %v2453_v19 = vmov 0   ;;  %s2917_s26 = sld [smem:[#allocation10_spill]] }
  0x27   : > { %2189 = vmatprep.mubr.msk.f32.mxu1 %vm834_vm2, %v766_v16  ;;  %2247 = vmatprep.mubr.msk.f32.mxu0 %vm834_vm2, %v766_v16  ;;  %v768_v17 = vld [vmem:[%s2594_s17] sm:$0xff]  ;;  %v767_v35 = vld [vmem:[%s2589_s0 + $0x8] sm:$0xff]  ;;  %v2454_v38 = vmov 0.0   ;;  %vm2455_vm3 = vmmov 0   ;;  %vm975_vm7 = vcmask 130048   ;;  %p2108_p6 = scmp.ne.s32.totalorder %s2443_s24, 1 }
  0x28   : > { %2364 = vset.pattern.permute.xlu1 %v2453_v19  ;;  %2363 = vset.pattern.permute.xlu0 %v2453_v19  ;;  %v771_v20 = vld [vmem:[%s2604_s20] sm:$0xff]  ;;  %s2919_s20 = scalar_lea.vmem %s2881_s2, %s2574_s29  ;;  %s2921_s1 = sld [smem:[#allocation14_spill]] (!%p2108_p6) }
  0x29   : > { %v2095_v30 = vld [vmem:[%s2919_s20] ss:$0 sm:$0xff]  ;;  %s2922_s0 = sld [smem:[#allocation15_spill]] (!%p2108_p6) }
  0x2a   : > { %s2923_s4 = sld [smem:[#allocation16_spill]] (!%p2108_p6) }
  0x2c   : > { %v2641_v2 = vld [vmem:[#allocation2] sm:$0xff]  ;;  %v2643_v3 = vld [vmem:[#allocation2 + $0x8] sm:$0xff]  ;;  %s2918_s19 = scalar_lea.vmem %s2917_s26, %s2574_s29 }
  0x2d   : > { %v796_v4 = vsel %vm795_vm1, %v2641_v2, 0.0  ;;  %v1263_v5 = vsel %vm795_vm1, %v2643_v3, 0.0  ;;  %v2094_v28 = vld [vmem:[%s2918_s19] ss:$0 sm:$0xff] }
  0x2e   : > { %797 = vadd.xlane.f32.xlu0 %v796_v4 }
  0x32   : > { %1264 = vadd.xlane.f32.xlu0 %v1263_v5 }
  0x48   : > { %831 = vperm.xlu0 %2363, %v769_v18  }
  0xb7   : > { %v798_v6 = vpop.xlane.xlu0 %797 }
  0xb8   : > { %v800_v7 = vmul.f32 0.03125, %v798_v6 }
  0xba   : > { %v801_v8 = vsub.f32 %v2641_v2, %v800_v7 }
  0xbb   : > { %v1265_v9 = vpop.xlane.xlu0 %1264 }
  0xbc   : > { %v1266_v10 = vmul.f32 0.03125, %v1265_v9  ;;  %v802_v11 = vmul.f32 %v801_v8, %v801_v8 }
  0xbe   : > { %v1267_v12 = vsub.f32 %v2643_v3, %v1266_v10  ;;  %v803_v13 = vsel %vm795_vm1, %v802_v11, 0.0 }
  0xbf   : > { %804 = vadd.xlane.f32.xlu1 %v803_v13 }
  0xc0   : > { %v1268_v14 = vmul.f32 %v1267_v12, %v1267_v12 }
  0xc2   : > { %v1269_v15 = vsel %vm795_vm1, %v1268_v14, 0.0 }
  0xc3   : > { %1270 = vadd.xlane.f32.xlu1 %v1269_v15  ;;  %v832_v39 = vpop.permute.xlu0 %831 }
  0xd4   : > { %826 = vperm.xlu1 %2364, %v768_v17  }
  0xd8   : > { %972 = vperm.xlu1 %2364, %v771_v20  }
 0x148   : > { %v805_v21 = vpop.xlane.xlu1 %804 }
 0x149   : > { %v806_v22 = vmul.f32 0.03125, %v805_v21 }
 0x14b   : > { %v807_v23 = vadd.f32 1e-06, %v806_v22 }
 0x14c   : > { %v1271_v24 = vpop.xlane.xlu1 %1270 }
 0x14d   : > { %2365 = vrsqrt.f32 %v807_v23  ;;  %v1272_v25 = vmul.f32 0.03125, %v1271_v24 }
 0x14f   : > { %v1273_v26 = vadd.f32 1e-06, %v1272_v25 }
 0x150   : > { %v827_v42 = vpop.permute.xlu1 %826 }
 0x151   : > { %2367 = vrsqrt.f32 %v1273_v26 }
 0x15a   : > { %v2366_v27 = vpop.eup %2365 }
 0x15b   : > { %v809_v29 = vmul.f32 %v2366_v27, %v801_v8 }
 0x15d   : > { %v816_v31 = vmul.f32 %v2094_v28, %v809_v29 }
 0x15e   : > { %v2368_v32 = vpop.eup %2367 }
 0x15f   : > { %v823_v33 = vadd.f32 %v2095_v30, %v816_v31  ;;  %v1275_v34 = vmul.f32 %v2368_v32, %v1267_v12 }
 0x161   : > { %2187 = vmatprep.subr.mxu1 %v823_v33  ;;  %v1276_v36 = vmul.f32 %v2094_v28, %v1275_v34 }
 0x162   : > { %2188 = vmatpush3.msra.mxu1 %v823_v33 }
 0x163   : > { %2190 = vmatmul.mubr.msk.f32.vlgmr.msra.gmra.mxu1 %vm834_vm2, %v767_v35  ;;  %v1277_v37 = vadd.f32 %v2095_v30, %v1276_v36  ;;  %2192 = vmatprep.subr.mxu1 %v2454_v38 }
 0x164   : > { %2196 = vmatprep.mubr.msk.f32.mxu1 %vm2455_vm3, %v2454_v38 }
 0x165   : > { %2245 = vmatprep.subr.mxu0 %v1277_v37 }
 0x166   : > { %2246 = vmatpush3.msra.mxu0 %v1277_v37 }
 0x167   : > { %2248 = vmatmul.mubr.msk.f32.vlgmr.msra.gmra.mxu0 %vm834_vm2, %v767_v35  ;;  %2250 = vmatprep.subr.mxu0 %v2454_v38 }
 0x168   : > { %2254 = vmatprep.mubr.msk.f32.mxu0 %vm2455_vm3, %v2454_v38 }
 0x223   : > { %v2191_v40 = vpop.f32.mrf.mxu1 }
 0x224   : > { %v2678_v41 = vadd.f32 %v2191_v40, %v832_v39 }
 0x225   : > { %v907_v43 = vpop.f32.mrf.mxu1 }
 0x226   : > { %v2681_v44 = vmul.f32 0.70710677, %v2678_v41  ;;  %v2683_v45 = vadd.f32 %v907_v43, %v827_v42 }
 0x227   : > { %v2249_v46 = vpop.f32.mrf.mxu0 }
 0x228   : > { %v921_v47 = vand.u32 2147483647, %v2681_v44  ;;  %v2687_v48 = vmul.f32 0.70710677, %v2683_v45  ;;  %v2689_v49 = vadd.f32 %v2249_v46, %v832_v39  ;;  %vm961_vm4 = vcmp.ge.f32.partialorder %v2681_v44, 0.0 }
 0x229   : > { %v1344_v50 = vpop.f32.mrf.mxu0 }
 0x22a   : > { %v923_v51 = vmul.f32 0.3275911, %v921_v47  ;;  %v920_v52 = vand.u32 2147483647, %v2687_v48  ;;  %v2693_v53 = vmul.f32 0.70710677, %v2689_v49  ;;  %v2695_v54 = vadd.f32 %v1344_v50, %v827_v42 }
 0x22b   : > { %v949_v1 = vsub.f32 0.0, %v921_v47  ;;  %vm960_vm5 = vcmp.ge.f32.partialorder %v2687_v48, 0.0  ;;  %v770_v48 = vld [vmem:[%s2599_s18] sm:$0xff]  ;;  %s2920_s18 = scalar_lea.vmem %s2886_s7, %s2574_s29 }
 0x22c   : > { %v925_v55 = vadd.f32 1.0, %v923_v51  ;;  %v922_v56 = vmul.f32 0.3275911, %v920_v52  ;;  %v1358_v57 = vand.u32 2147483647, %v2693_v53  ;;  %v948_v4 = vsub.f32 0.0, %v920_v52 }
 0x22d   : > { %v2699_v58 = vmul.f32 0.70710677, %v2695_v54  ;;  %v951_v5 = vmul.f32 %v949_v1, %v921_v47  ;;  %vm1398_vm6 = vcmp.ge.f32.partialorder %v2693_v53, 0.0 }
 0x22e   : > { %2369 = vrcp.f32 %v925_v55  ;;  %v924_v59 = vadd.f32 1.0, %v922_v56  ;;  %v1360_v60 = vmul.f32 0.3275911, %v1358_v57  ;;  %v1386_v6 = vsub.f32 0.0, %v1358_v57 }
 0x22f   : > { %v1357_v61 = vand.u32 2147483647, %v2699_v58  ;;  %v950_v8 = vmul.f32 %v948_v4, %v920_v52  ;;  %v954_v10 = vmul.f32 1.442695, %v951_v5  ;;  %vm1397_vm8 = vcmp.ge.f32.partialorder %v2699_v58, 0.0 }
 0x230   : > { %2371 = vrcp.f32 %v924_v59  ;;  %v1362_v62 = vadd.f32 1.0, %v1360_v60  ;;  %v1388_v12 = vmul.f32 %v1386_v6, %v1358_v57 }
 0x231   : > { %v1359_v63 = vmul.f32 0.3275911, %v1357_v61  ;;  %v1385_v11 = vsub.f32 0.0, %v1357_v61  ;;  %v952_v16 = vmul.f32 1.442695, %v950_v8 }
 0x232   : > { %2373 = vrcp.f32 %v1362_v62  ;;  %v1391_v22 = vmul.f32 1.442695, %v1388_v12 }
 0x233   : > { %v1361_v0 = vadd.f32 1.0, %v1359_v63  ;;  %v1387_v19 = vmul.f32 %v1385_v11, %v1357_v61 }
 0x235   : > { %2375 = vrcp.f32 %v1361_v0  ;;  %v1389_v29 = vmul.f32 1.442695, %v1387_v19 }
 0x236   : > { %2377 = vpow2.f32 %v954_v10 }
 0x237   : > { %2379 = vpow2.f32 %v952_v16 }
 0x238   : > { %2381 = vpow2.f32 %v1391_v22 }
 0x239   : > { %2383 = vpow2.f32 %v1389_v29 }
 0x23b   : > { %v2370_v7 = vpop.eup %2369 }
 0x23c   : > { %v931_v9 = vmul.f32 1.0614054, %v2370_v7 }
 0x23d   : > { %v2372_v13 = vpop.eup %2371 }
 0x23e   : > { %v933_v14 = vadd.f32 -1.4531521, %v931_v9  ;;  %v930_v15 = vmul.f32 1.0614054, %v2372_v13 }
 0x23f   : > { %v2374_v17 = vpop.eup %2373 }
 0x240   : > { %v935_v18 = vmul.f32 %v2370_v7, %v933_v14  ;;  %v932_v20 = vadd.f32 -1.4531521, %v930_v15  ;;  %v1368_v21 = vmul.f32 1.0614054, %v2374_v17  ;;  %v917_v14 = vmul.f32 0.5, %v2678_v41 }
 0x242   : > { %v937_v23 = vadd.f32 1.4214138, %v935_v18  ;;  %v2376_v24 = vpop.eup %2375  ;;  %v934_v25 = vmul.f32 %v2372_v13, %v932_v20  ;;  %v1370_v26 = vadd.f32 -1.4531521, %v1368_v21  ;;  %v916_v21 = vmul.f32 0.5, %v2683_v45 }
 0x243   : > { %v1367_v28 = vmul.f32 1.0614054, %v2376_v24  ;;  %v2378_v52 = vpop.eup %2377  ;;  %v1353_v45 = vmul.f32 0.5, %v2695_v54  ;;  %v973_v54 = vpop.permute.xlu1 %972 }
 0x244   : > { %v939_v27 = vmul.f32 %v2370_v7, %v937_v23  ;;  %v936_v30 = vadd.f32 1.4214138, %v934_v25  ;;  %v1372_v31 = vmul.f32 %v2374_v17, %v1370_v26  ;;  %v2380_v62 = vpop.eup %2379 }
 0x245   : > { %v1369_v33 = vadd.f32 -1.4531521, %v1367_v28  ;;  %v2382_v5 = vpop.eup %2381 }
 0x246   : > { %v941_v32 = vadd.f32 -0.28449672, %v939_v27  ;;  %v938_v34 = vmul.f32 %v2372_v13, %v936_v30  ;;  %v1374_v35 = vadd.f32 1.4214138, %v1372_v31  ;;  %v2384_v12 = vpop.eup %2383 }
 0x247   : > { %v1371_v37 = vmul.f32 %v2376_v24, %v1369_v33 }
 0x248   : > { %v943_v36 = vmul.f32 %v2370_v7, %v941_v32  ;;  %v940_v39 = vadd.f32 -0.28449672, %v938_v34  ;;  %v1376_v40 = vmul.f32 %v2374_v17, %v1374_v35 }
 0x249   : > { %v1373_v43 = vadd.f32 1.4214138, %v1371_v37 }
 0x24a   : > { %v945_v42 = vadd.f32 0.2548296, %v943_v36  ;;  %v942_v46 = vmul.f32 %v2372_v13, %v940_v39  ;;  %v1378_v47 = vadd.f32 -0.28449672, %v1376_v40 }
 0x24b   : > { %v1375_v51 = vmul.f32 %v2376_v24, %v1373_v43 }
 0x24c   : > { %v947_v50 = vmul.f32 %v2370_v7, %v945_v42  ;;  %v944_v55 = vadd.f32 0.2548296, %v942_v46  ;;  %v1380_v56 = vmul.f32 %v2374_v17, %v1378_v47 }
 0x24d   : > { %v1377_v59 = vadd.f32 -0.28449672, %v1375_v51 }
 0x24e   : > { %v957_v57 = vmul.f32 %v2378_v52, %v947_v50  ;;  %v946_v60 = vmul.f32 %v2372_v13, %v944_v55  ;;  %v1382_v61 = vadd.f32 0.2548296, %v1380_v56  ;;  %v775_v52 = vld [vmem:[%s2622_s13 + $0x18] sm:$0xff]  ;;  %v774_v55 = vld [vmem:[%s2622_s13 + $0x10] sm:$0xff]  ;;  %v773_v56 = vld [vmem:[%s2622_s13 + $0x8] sm:$0xff] }
 0x24f   : > { %v1379_v0 = vmul.f32 %v2376_v24, %v1377_v59 }
 0x250   : > { %v959_v63 = vsub.f32 1.0, %v957_v57  ;;  %v956_v1 = vmul.f32 %v2380_v62, %v946_v60  ;;  %v1384_v4 = vmul.f32 %v2374_v17, %v1382_v61  ;;  %v772_v57 = vld [vmem:[%s2622_s13] sm:$0xff] }
 0x251   : > { %v1381_v8 = vadd.f32 0.2548296, %v1379_v0 }
 0x252   : > { %v963_v6 = vsub.f32 0.0, %v959_v63  ;;  %v958_v9 = vsub.f32 1.0, %v956_v1  ;;  %v1394_v7 = vmul.f32 %v2382_v5, %v1384_v4  ;;  %v2099_v4 = vld [vmem:[%s2920_s18] ss:$0 sm:$0xff] }
 0x253   : > { %v1383_v11 = vmul.f32 %v2376_v24, %v1381_v8  ;;  %v1354_v24 = vmul.f32 0.5, %v2689_v49 }
 0x254   : > { %v965_v10 = vsel %vm961_vm4, %v959_v63, %v963_v6  ;;  %v962_v13 = vsub.f32 0.0, %v958_v9  ;;  %v1396_v16 = vsub.f32 1.0, %v1394_v7  ;;  %v2100_v6 = vld [vmem:[%s735_s25] ss:$0 sm:$0xff] }
 0x255   : > { %v967_v15 = vadd.f32 1.0, %v965_v10  ;;  %v1393_v18 = vmul.f32 %v2384_v12, %v1383_v11 }
 0x256   : > { %v964_v19 = vsel %vm960_vm5, %v958_v9, %v962_v13  ;;  %v1400_v20 = vsub.f32 0.0, %v1396_v16  ;;  %v790_v13 = vld [vmem:[%s2628_s14 + $0x68] sm:$0xff] }
 0x257   : > { %v969_v17 = vmul.f32 %v967_v15, %v917_v14  ;;  %v966_v44 = vadd.f32 1.0, %v964_v19  ;;  %v1395_v22 = vsub.f32 1.0, %v1393_v18  ;;  %v792_v14 = vld [vmem:[%s2628_s14 + $0x78] sm:$0xff]  ;;  %v791_v15 = vld [vmem:[%s2628_s14 + $0x70] sm:$0xff]  ;;  %v786_v19 = vld [vmem:[%s2628_s14 + $0x48] sm:$0xff] }
 0x258   : > { %v1402_v23 = vsel %vm1398_vm6, %v1396_v16, %v1400_v20  ;;  %v789_v16 = vld [vmem:[%s2628_s14 + $0x60] sm:$0xff]  ;;  %v788_v18 = vld [vmem:[%s2628_s14 + $0x58] sm:$0xff] }
 0x259   : > { %2193 = vmatpush3.msra.mxu1 %v969_v17  ;;  %v968_v41 = vmul.f32 %v966_v44, %v916_v21  ;;  %v1404_v25 = vadd.f32 1.0, %v1402_v23  ;;  %v1399_v26 = vsub.f32 0.0, %v1395_v22  ;;  %v787_v17 = vld [vmem:[%s2628_s14 + $0x50] sm:$0xff]  ;;  %v785_v20 = vld [vmem:[%s2628_s14 + $0x40] sm:$0xff]  ;;  %v784_v21 = vld [vmem:[%s2628_s14 + $0x38] sm:$0xff] }
 0x25a   : > { %2194 = vmatprep.subr.mxu1 %v2454_v38  ;;  %v783_v44 = vld [vmem:[%s2628_s14 + $0x30] sm:$0xff]  ;;  %v781_v23 = vld [vmem:[%s2628_s14 + $0x20] sm:$0xff] }
 0x25b   : > { %v1406_v27 = vmul.f32 %v1404_v25, %v1354_v24  ;;  %v1401_v28 = vsel %vm1397_vm8, %v1395_v22, %v1399_v26  ;;  %2195 = vmatpush3.msra.mxu1 %v968_v41  ;;  %v782_v22 = vld [vmem:[%s2628_s14 + $0x28] sm:$0xff]  ;;  %v780_v41 = vld [vmem:[%s2628_s14 + $0x18] sm:$0xff]  ;;  %v779_v24 = vld [vmem:[%s2628_s14 + $0x10] sm:$0xff] }
 0x25c   : > { %v1403_v53 = vadd.f32 1.0, %v1401_v28  ;;  %2197 = vmatmul.mubr.msk.f32.vlgmr.msra.gmra.mxu1 %vm975_vm7, %v770_v48  ;;  %2199 = vmatprep.subr.mxu1 %v2454_v38  ;;  %v778_v25 = vld [vmem:[%s2628_s14 + $0x8] sm:$0xff]  ;;  %v777_v26 = vld [vmem:[%s2628_s14] sm:$0xff] }
 0x25d   : > { %2251 = vmatpush3.msra.mxu0 %v1406_v27  ;;  %2207 = vmatprep.mubr.msk.f32.mxu1 %vm2455_vm3, %v2454_v38 }
 0x25e   : > { %v1405_v49 = vmul.f32 %v1403_v53, %v1353_v45  ;;  %2252 = vmatprep.subr.mxu0 %v2454_v38  ;;  %2200 = vmatpush3.msra.mxu1 %v775_v52 }
 0x25f   : > { %2201 = vmatprep.subr.mxu1 %v2454_v38 }
 0x260   : > { %2253 = vmatpush3.msra.mxu0 %v1405_v49  ;;  %2202 = vmatpush3.msra.mxu1 %v774_v55 }
 0x261   : > { %2255 = vmatmul.mubr.msk.f32.vlgmr.msra.gmra.mxu0 %vm975_vm7, %v770_v48  ;;  %2257 = vmatprep.subr.mxu0 %v2454_v38  ;;  %v2101_v48 = vld [vmem:[%s743_s16] ss:$0 sm:$0xff] }
 0x262   : > { %2265 = vmatprep.mubr.msk.f32.mxu0 %vm2455_vm3, %v2454_v38  ;;  %2258 = vmatpush3.msra.mxu0 %v775_v52 }
 0x263   : > { %2259 = vmatprep.subr.mxu0 %v2454_v38  ;;  %2203 = vmatprep.subr.mxu1 %v2454_v38 }
 0x264   : > { %2260 = vmatpush3.msra.mxu0 %v774_v55  ;;  %2204 = vmatpush3.msra.mxu1 %v773_v56 }
 0x265   : > { %2261 = vmatprep.subr.mxu0 %v2454_v38  ;;  %2205 = vmatprep.subr.mxu1 %v2454_v38 }
 0x266   : > { %2262 = vmatpush3.msra.mxu0 %v773_v56  ;;  %2206 = vmatpush3.msra.mxu1 %v772_v57 }
 0x267   : > { %2263 = vmatprep.subr.mxu0 %v2454_v38  ;;  %2210 = vmatprep.subr.mxu1 %v2454_v38 }
 0x268   : > { %2264 = vmatpush3.msra.mxu0 %v772_v57 }
 0x269   : > { %2268 = vmatprep.subr.mxu0 %v2454_v38 }
 0x31c   : > { %v1045_v58 = vpop.f32.mrf.mxu1 }
 0x31d   : > { %v1046_v29 = vadd.f32 %v1045_v58, %v973_v54 }
 0x31e   : > { %v2198_v30 = vpop.f32.mrf.mxu1 }
 0x31f   : > { %v2722_v31 = vadd.f32 %v1046_v29, %v2641_v2 }
 0x321   : > { %v1473_v32 = vpop.f32.mrf.mxu0  ;;  %v1050_v33 = vsel %vm795_vm1, %v2722_v31, 0.0 }
 0x322   : > { %v1474_v34 = vadd.f32 %v1473_v32, %v973_v54  ;;  %1051 = vadd.xlane.f32.xlu1 %v1050_v33 }
 0x323   : > { %v2256_v35 = vpop.f32.mrf.mxu0 }
 0x324   : > { %v2727_v36 = vadd.f32 %v1474_v34, %v2643_v3 }
 0x326   : > { %v1478_v37 = vsel %vm795_vm1, %v2727_v36, 0.0 }
 0x327   : > { %1479 = vadd.xlane.f32.xlu0 %v1478_v37 }
 0x3ab   : > { %v1052_v39 = vpop.xlane.xlu1 %1051 }
 0x3ac   : > { %v1053_v40 = vmul.f32 0.03125, %v1052_v39 }
 0x3ae   : > { %v1054_v2 = vsub.f32 %v2722_v31, %v1053_v40 }
 0x3b0   : > { %v1480_v42 = vpop.xlane.xlu0 %1479  ;;  %v1055_v43 = vmul.f32 %v1054_v2, %v1054_v2 }
 0x3b1   : > { %v1481_v46 = vmul.f32 0.03125, %v1480_v42 }
 0x3b2   : > { %v1056_v47 = vsel %vm795_vm1, %v1055_v43, 0.0 }
 0x3b3   : > { %v1482_v50 = vsub.f32 %v2727_v36, %v1481_v46  ;;  %1057 = vadd.xlane.f32.xlu1 %v1056_v47 }
 0x3b5   : > { %v1483_v3 = vmul.f32 %v1482_v50, %v1482_v50 }
 0x3b7   : > { %v1484_v51 = vsel %vm795_vm1, %v1483_v3, 0.0 }
 0x3b8   : > { %1485 = vadd.xlane.f32.xlu1 %v1484_v51 }
 0x43c   : > { %v1058_v59 = vpop.xlane.xlu1 %1057 }
 0x43d   : > { %v1059_v60 = vmul.f32 0.03125, %v1058_v59 }
 0x43f   : > { %v1060_v61 = vadd.f32 1e-06, %v1059_v60 }
 0x441   : > { %2385 = vrsqrt.f32 %v1060_v61  ;;  %v1486_v62 = vpop.xlane.xlu1 %1485 }
 0x442   : > { %v1487_v63 = vmul.f32 0.03125, %v1486_v62 }
 0x444   : > { %v1488_v0 = vadd.f32 1e-06, %v1487_v63 }
 0x446   : > { %2387 = vrsqrt.f32 %v1488_v0 }
 0x44e   : > { %v2386_v1 = vpop.eup %2385 }
 0x44f   : > { %v1062_v5 = vmul.f32 %v2386_v1, %v1054_v2 }
 0x451   : > { %v1069_v8 = vmul.f32 %v2099_v4, %v1062_v5 }
 0x453   : > { %v2388_v9 = vpop.eup %2387  ;;  %v1076_v7 = vadd.f32 %v2100_v6, %v1069_v8 }
 0x454   : > { %v1490_v10 = vmul.f32 %v2388_v9, %v1482_v50 }
 0x455   : > { %2208 = vmatmul.mubr.msk.f32.vlgmr.msra.gmra.mxu1 %vm795_vm1, %v1076_v7 }
 0x456   : > { %v1491_v11 = vmul.f32 %v2099_v4, %v1490_v10  ;;  %2242 = vmatprep.mubr.msk.f32.mxu1 %vm2455_vm3, %v2454_v38  ;;  %2211 = vmatpush3.msra.mxu1 %v792_v14 }
 0x457   : > { %2212 = vmatprep.subr.mxu1 %v2454_v38 }
 0x458   : > { %v1492_v12 = vadd.f32 %v2100_v6, %v1491_v11  ;;  %2213 = vmatpush3.msra.mxu1 %v791_v15 }
 0x459   : > { %2214 = vmatprep.subr.mxu1 %v2454_v38 }
 0x45a   : > { %2266 = vmatmul.mubr.msk.f32.vlgmr.msra.gmra.mxu0 %vm795_vm1, %v1492_v12  ;;  %2215 = vmatpush3.msra.mxu1 %v790_v13 }
 0x45b   : > { %2300 = vmatprep.mubr.msk.f32.mxu0 %vm2455_vm3, %v2454_v38  ;;  %2269 = vmatpush3.msra.mxu0 %v792_v14 }
 0x45c   : > { %2270 = vmatprep.subr.mxu0 %v2454_v38  ;;  %2216 = vmatprep.subr.mxu1 %v2454_v38 }
 0x45d   : > { %2271 = vmatpush3.msra.mxu0 %v791_v15  ;;  %2217 = vmatpush3.msra.mxu1 %v789_v16 }
 0x45e   : > { %2272 = vmatprep.subr.mxu0 %v2454_v38  ;;  %2218 = vmatprep.subr.mxu1 %v2454_v38 }
 0x45f   : > { %2273 = vmatpush3.msra.mxu0 %v790_v13  ;;  %2219 = vmatpush3.msra.mxu1 %v788_v18 }
 0x460   : > { %2274 = vmatprep.subr.mxu0 %v2454_v38  ;;  %2220 = vmatprep.subr.mxu1 %v2454_v38 }
 0x461   : > { %2275 = vmatpush3.msra.mxu0 %v789_v16  ;;  %2221 = vmatpush3.msra.mxu1 %v787_v17 }
 0x462   : > { %2276 = vmatprep.subr.mxu0 %v2454_v38  ;;  %2222 = vmatprep.subr.mxu1 %v2454_v38 }
 0x463   : > { %2277 = vmatpush3.msra.mxu0 %v788_v18  ;;  %2223 = vmatpush3.msra.mxu1 %v786_v19 }
 0x464   : > { %2278 = vmatprep.subr.mxu0 %v2454_v38  ;;  %2224 = vmatprep.subr.mxu1 %v2454_v38 }
 0x465   : > { %2279 = vmatpush3.msra.mxu0 %v787_v17  ;;  %2225 = vmatpush3.msra.mxu1 %v785_v20 }
 0x466   : > { %2280 = vmatprep.subr.mxu0 %v2454_v38  ;;  %2226 = vmatprep.subr.mxu1 %v2454_v38 }
 0x467   : > { %2281 = vmatpush3.msra.mxu0 %v786_v19  ;;  %2227 = vmatpush3.msra.mxu1 %v784_v21 }
 0x468   : > { %2282 = vmatprep.subr.mxu0 %v2454_v38  ;;  %2228 = vmatprep.subr.mxu1 %v2454_v38 }
 0x469   : > { %2283 = vmatpush3.msra.mxu0 %v785_v20  ;;  %2229 = vmatpush3.msra.mxu1 %v783_v44 }
 0x46a   : > { %2284 = vmatprep.subr.mxu0 %v2454_v38  ;;  %2230 = vmatprep.subr.mxu1 %v2454_v38 }
 0x46b   : > { %2285 = vmatpush3.msra.mxu0 %v784_v21  ;;  %2231 = vmatpush3.msra.mxu1 %v782_v22 }
 0x46c   : > { %2286 = vmatprep.subr.mxu0 %v2454_v38  ;;  %2232 = vmatprep.subr.mxu1 %v2454_v38 }
 0x46d   : > { %2287 = vmatpush3.msra.mxu0 %v783_v44  ;;  %2233 = vmatpush3.msra.mxu1 %v781_v23 }
 0x46e   : > { %2288 = vmatprep.subr.mxu0 %v2454_v38  ;;  %2234 = vmatprep.subr.mxu1 %v2454_v38 }
 0x46f   : > { %2289 = vmatpush3.msra.mxu0 %v782_v22  ;;  %2235 = vmatpush3.msra.mxu1 %v780_v41 }
 0x470   : > { %2290 = vmatprep.subr.mxu0 %v2454_v38  ;;  %2236 = vmatprep.subr.mxu1 %v2454_v38 }
 0x471   : > { %2291 = vmatpush3.msra.mxu0 %v781_v23  ;;  %2237 = vmatpush3.msra.mxu1 %v779_v24  ;;  %v2103_v23 = vld [vmem:[%s751_s3] ss:$0 sm:$0xff] }
 0x472   : > { %2292 = vmatprep.subr.mxu0 %v2454_v38  ;;  %2238 = vmatprep.subr.mxu1 %v2454_v38 }
 0x473   : > { %2293 = vmatpush3.msra.mxu0 %v780_v41  ;;  %2239 = vmatpush3.msra.mxu1 %v778_v25 }
 0x474   : > { %2294 = vmatprep.subr.mxu0 %v2454_v38  ;;  %2240 = vmatprep.subr.mxu1 %v2454_v38 }
 0x475   : > { %2295 = vmatpush3.msra.mxu0 %v779_v24  ;;  %2241 = vmatpush3.msra.mxu1 %v777_v26 }
 0x476   : > { %2296 = vmatprep.subr.mxu0 %v2454_v38 }
 0x477   : > { %2297 = vmatpush3.msra.mxu0 %v778_v25 }
 0x478   : > { %2298 = vmatprep.subr.mxu0 %v2454_v38 }
 0x479   : > { %2299 = vmatpush3.msra.mxu0 %v777_v26 }
 0x515   : > { %v1152_v27 = vpop.f32.mrf.mxu1 }
 0x516   : > { %v1153_v28 = vadd.f32 %v2101_v48, %v1152_v27 }
 0x517   : > { %v2209_v45 = vpop.f32.mrf.mxu1 }
 0x518   : > { %v1157_v53 = vmul.f32 0.70710677, %v1153_v28  ;;  %v1156_v13 = vmul.f32 0.5, %v1153_v28 }
 0x51a   : > { %v1158_v49 = vand.u32 2147483647, %v1157_v53  ;;  %v1562_v54 = vpop.f32.mrf.mxu0  ;;  %vm1178_vm9 = vcmp.ge.f32.partialorder %v1157_v53, 0.0 }
 0x51b   : > { %v1563_v58 = vadd.f32 %v2101_v48, %v1562_v54 }
 0x51c   : > { %v1159_v29 = vmul.f32 0.3275911, %v1158_v49  ;;  %v2267_v30 = vpop.f32.mrf.mxu0  ;;  %v1172_v37 = vsub.f32 0.0, %v1158_v49 }
 0x51d   : > { %v1567_v32 = vmul.f32 0.70710677, %v1563_v58  ;;  %v1566_v21 = vmul.f32 0.5, %v1563_v58 }
 0x51e   : > { %v1160_v33 = vadd.f32 1.0, %v1159_v29  ;;  %v1173_v39 = vmul.f32 %v1172_v37, %v1158_v49 }
 0x51f   : > { %v1568_v34 = vand.u32 2147483647, %v1567_v32  ;;  %vm1588_vm10 = vcmp.ge.f32.partialorder %v1567_v32, 0.0 }
 0x520   : > { %2389 = vrcp.f32 %v1160_v33  ;;  %v1174_v43 = vmul.f32 1.442695, %v1173_v39 }
 0x521   : > { %v1569_v38 = vmul.f32 0.3275911, %v1568_v34  ;;  %v1582_v40 = vsub.f32 0.0, %v1568_v34 }
 0x523   : > { %v1570_v35 = vadd.f32 1.0, %v1569_v38  ;;  %v1583_v46 = vmul.f32 %v1582_v40, %v1568_v34 }
 0x525   : > { %2391 = vrcp.f32 %v1570_v35  ;;  %v1584_v52 = vmul.f32 1.442695, %v1583_v46 }
 0x526   : > { %2393 = vpow2.f32 %v1174_v43 }
 0x527   : > { %2395 = vpow2.f32 %v1584_v52 }
 0x52d   : > { %v2390_v2 = vpop.eup %2389 }
 0x52e   : > { %v1163_v42 = vmul.f32 1.0614054, %v2390_v2 }
 0x530   : > { %v1164_v47 = vadd.f32 -1.4531521, %v1163_v42 }
 0x532   : > { %v2392_v50 = vpop.eup %2391  ;;  %v1165_v3 = vmul.f32 %v2390_v2, %v1164_v47 }
 0x533   : > { %v1573_v51 = vmul.f32 1.0614054, %v2392_v50  ;;  %v2394_v5 = vpop.eup %2393 }
 0x534   : > { %v1166_v55 = vadd.f32 1.4214138, %v1165_v3  ;;  %v2396_v11 = vpop.eup %2395 }
 0x535   : > { %v1574_v56 = vadd.f32 -1.4531521, %v1573_v51 }
 0x536   : > { %v1167_v57 = vmul.f32 %v2390_v2, %v1166_v55 }
 0x537   : > { %v1575_v59 = vmul.f32 %v2392_v50, %v1574_v56 }
 0x538   : > { %v1168_v60 = vadd.f32 -0.28449672, %v1167_v57 }
 0x539   : > { %v1576_v61 = vadd.f32 1.4214138, %v1575_v59 }
 0x53a   : > { %v1169_v62 = vmul.f32 %v2390_v2, %v1168_v60 }
 0x53b   : > { %v1577_v63 = vmul.f32 %v2392_v50, %v1576_v61 }
 0x53c   : > { %v1170_v0 = vadd.f32 0.2548296, %v1169_v62 }
 0x53d   : > { %v1578_v1 = vadd.f32 -0.28449672, %v1577_v63 }
 0x53e   : > { %v1171_v4 = vmul.f32 %v2390_v2, %v1170_v0 }
 0x53f   : > { %v1579_v6 = vmul.f32 %v2392_v50, %v1578_v1 }
 0x540   : > { %v1176_v8 = vmul.f32 %v2394_v5, %v1171_v4 }
 0x541   : > { %v1580_v9 = vadd.f32 0.2548296, %v1579_v6 }
 0x542   : > { %v1177_v7 = vsub.f32 1.0, %v1176_v8 }
 0x543   : > { %v1581_v10 = vmul.f32 %v2392_v50, %v1580_v9 }
 0x544   : > { %v1179_v12 = vsub.f32 0.0, %v1177_v7 }
 0x545   : > { %v1586_v14 = vmul.f32 %v2396_v11, %v1581_v10 }
 0x546   : > { %v1180_v15 = vsel %vm1178_vm9, %v1177_v7, %v1179_v12 }
 0x547   : > { %v1181_v16 = vadd.f32 1.0, %v1180_v15  ;;  %v1587_v18 = vsub.f32 1.0, %v1586_v14 }
 0x549   : > { %v1182_v17 = vmul.f32 %v1181_v16, %v1156_v13  ;;  %v1589_v19 = vsub.f32 0.0, %v1587_v18 }
 0x54b   : > { %v1590_v20 = vsel %vm1588_vm10, %v1587_v18, %v1589_v19  ;;  %2243 = vmatmul.mubr.f32.vlgmr.msra.gmra.mxu1 %v1182_v17 }
 0x54c   : > { %v1591_v44 = vadd.f32 1.0, %v1590_v20 }
 0x54e   : > { %v1592_v22 = vmul.f32 %v1591_v44, %v1566_v21 }
 0x550   : > { %2301 = vmatmul.mubr.f32.vlgmr.msra.gmra.mxu0 %v1592_v22 }
 0x60b   : > { %v1255_v41 = vpop.f32.mrf.mxu1 }
 0x60c   : > { %v1256_v24 = vadd.f32 %v2103_v23, %v1255_v41 }
 0x60d   : > { %v2244_v25 = vpop.f32.mrf.mxu1 }
 0x60e   : > { %v1259_v26 = vadd.f32 %v1256_v24, %v2722_v31 }
 0x610   : > { %1260 = vst.msk [vmem:[#allocation2] sm:$0xff] %vm795_vm1, %v1259_v26  ;;  %v1659_v48 = vpop.f32.mrf.mxu0 }
 0x611   : > { %v1660_v27 = vadd.f32 %v2103_v23, %v1659_v48  ;;  %1668 = sbr.rel (%p2108_p6) target bundleno = 2084 (0x824), region = 96 }
 0x612   : > { %v2302_v28 = vpop.f32.mrf.mxu0 }
 0x613   : > { %v1663_v45 = vadd.f32 %v1660_v27, %v2727_v36 }
 0x615   : > { %1664 = vst.msk [vmem:[#allocation2 + $0x8] sm:$0xff] %vm795_vm1, %v1663_v45 }
 0x616   : > { %v1674_v39 = vld [vmem:[%s2894_s15 + $0x18] sm:$0xff]  ;;  %v2456_v40 = vmov 0.0   ;;  %v1673_v2 = vld [vmem:[%s2894_s15 + $0x10] sm:$0xff]  ;;  %v1672_v42 = vld [vmem:[%s2894_s15 + $0x8] sm:$0xff]  ;;  %vm2457_vm11 = vmmov 0   ;;  %vm1786_vm12 = vcmask 16384  }
 0x617   : > { %v1676_v53 = vld [vmem:[#allocation2] sm:$0xff]  ;;  %2303 = vmatprep.subr.mxu0 %v2456_v40  ;;  %2314 = vmatprep.subr.mxu1 %v2456_v40 }
 0x618   : > { %v1677_v54 = vsel %vm795_vm1, %v1676_v53, 0.0  ;;  %2304 = vmatpush3.msra.mxu0 %v1674_v39  ;;  %2315 = vmatpush3.msra.mxu1 %v1674_v39  ;;  %v1671_v43 = vld [vmem:[%s2894_s15] sm:$0xff] }
 0x619   : > { %1678 = vadd.xlane.f32.xlu0 %v1677_v54  ;;  %2305 = vmatprep.subr.mxu0 %v2456_v40  ;;  %v2109_v56 = vld [vmem:[%s2921_s1] ss:$0 sm:$0xff] }
 0x61a   : > { %2316 = vmatprep.subr.mxu1 %v2456_v40  ;;  %2306 = vmatpush3.msra.mxu0 %v1673_v2  ;;  %v2110_v59 = vld [vmem:[%s2922_s0] ss:$0 sm:$0xff] }
 0x61b   : > { %2311 = vmatprep.mubr.msk.f32.mxu0 %vm2457_vm11, %v2456_v40  ;;  %2307 = vmatprep.subr.mxu0 %v2456_v40  ;;  %v1675_v20 = vld [vmem:[%s2923_s4] sm:$0x1] }
 0x61c   : > { %v1788_v49 = vld [vmem:[#allocation2 + $0x8] sm:$0xff]  ;;  %2317 = vmatpush3.msra.mxu1 %v1673_v2  ;;  %2308 = vmatpush3.msra.mxu0 %v1672_v42 }
 0x61d   : > { %v1789_v58 = vsel %vm795_vm1, %v1788_v49, 0.0  ;;  %2318 = vmatprep.subr.mxu1 %v2456_v40  ;;  %2309 = vmatprep.subr.mxu0 %v2456_v40 }
 0x61e   : > { %1790 = vadd.xlane.f32.xlu0 %v1789_v58  ;;  %2319 = vmatpush3.msra.mxu1 %v1672_v42 }
 0x61f   : > { %2310 = vmatpush3.msra.mxu0 %v1671_v43  ;;  %2320 = vmatprep.subr.mxu1 %v2456_v40 }
 0x620   : > { %2321 = vmatpush3.msra.mxu1 %v1671_v43  ;;  %2322 = vmatprep.mubr.msk.f32.mxu1 %vm2457_vm11, %v2456_v40 }
 0x6a2   : > { %v1679_v31 = vpop.xlane.xlu0 %1678 }
 0x6a3   : > { %v1680_v29 = vmul.f32 0.03125, %v1679_v31 }
 0x6a5   : > { %v1681_v30 = vsub.f32 %v1676_v53, %v1680_v29 }
 0x6a7   : > { %v1791_v32 = vpop.xlane.xlu0 %1790  ;;  %v1682_v34 = vmul.f32 %v1681_v30, %v1681_v30 }
 0x6a8   : > { %v1792_v33 = vmul.f32 0.03125, %v1791_v32 }
 0x6a9   : > { %v1683_v38 = vsel %vm795_vm1, %v1682_v34, 0.0 }
 0x6aa   : > { %v1793_v36 = vsub.f32 %v1788_v49, %v1792_v33  ;;  %1684 = vadd.xlane.f32.xlu1 %v1683_v38 }
 0x6ac   : > { %v1794_v35 = vmul.f32 %v1793_v36, %v1793_v36 }
 0x6ae   : > { %v1795_v37 = vsel %vm795_vm1, %v1794_v35, 0.0 }
 0x6af   : > { %1796 = vadd.xlane.f32.xlu1 %v1795_v37 }
 0x733   : > { %v1685_v46 = vpop.xlane.xlu1 %1684 }
 0x734   : > { %v1686_v47 = vmul.f32 0.03125, %v1685_v46 }
 0x736   : > { %v1687_v50 = vadd.f32 1e-06, %v1686_v47 }
 0x738   : > { %v1797_v3 = vpop.xlane.xlu1 %1796  ;;  %2397 = vrsqrt.f32 %v1687_v50 }
 0x739   : > { %v1798_v51 = vmul.f32 0.03125, %v1797_v3 }
 0x73b   : > { %v1799_v52 = vadd.f32 1e-06, %v1798_v51 }
 0x73d   : > { %2399 = vrsqrt.f32 %v1799_v52 }
 0x745   : > { %v2398_v55 = vpop.eup %2397 }
 0x746   : > { %v1689_v57 = vmul.f32 %v2398_v55, %v1681_v30 }
 0x748   : > { %v1696_v60 = vmul.f32 %v2109_v56, %v1689_v57 }
 0x74a   : > { %v2400_v61 = vpop.eup %2399  ;;  %v1703_v62 = vadd.f32 %v2110_v59, %v1696_v60 }
 0x74b   : > { %v1801_v63 = vmul.f32 %v2400_v61, %v1793_v36 }
 0x74c   : > { %v1704_v0 = vsel %vm795_vm1, %v1703_v62, 0.0 }
 0x74d   : > { %v1802_v1 = vmul.f32 %v2109_v56, %v1801_v63  ;;  %v1705_v4 = vrot.slane %v1704_v0, 4 }
 0x74f   : > { %v1803_v5 = vadd.f32 %v2110_v59, %v1802_v1  ;;  %v1706_v6 = vadd.f32 %v1705_v4, %v1704_v0 }
 0x751   : > { %v1804_v8 = vsel %vm795_vm1, %v1803_v5, 0.0  ;;  %v1707_v9 = vrot.slane %v1706_v6, 2 }
 0x752   : > { %v1805_v7 = vrot.slane %v1804_v8, 4 }
 0x753   : > { %v1708_v10 = vadd.f32 %v1707_v9, %v1706_v6 }
 0x754   : > { %v1806_v11 = vadd.f32 %v1805_v7, %v1804_v8 }
 0x755   : > { %v1709_v12 = vrot.slane %v1708_v10, 1 }
 0x756   : > { %v1807_v14 = vrot.slane %v1806_v11, 2 }
 0x757   : > { %v1710_v15 = vadd.f32 %v1709_v12, %v1708_v10 }
 0x758   : > { %v1808_v13 = vadd.f32 %v1807_v14, %v1806_v11 }
 0x759   : > { %v1712_v16 = vmul.f32 0.125, %v1710_v15 }
 0x75a   : > { %v1809_v18 = vrot.slane %v1808_v13, 1 }
 0x75b   : > { %2312 = vmatmul.mubr.msk.f32.vlgmr.msra.gmra.mxu0 %vm795_vm1, %v1712_v16 }
 0x75c   : > { %v1810_v17 = vadd.f32 %v1809_v18, %v1808_v13 }
 0x75e   : > { %v1811_v19 = vmul.f32 0.125, %v1810_v17 }
 0x760   : > { %2323 = vmatmul.mubr.msk.f32.vlgmr.msra.gmra.mxu1 %vm795_vm1, %v1811_v19 }
 0x81b   : > { %v1782_v21 = vpop.f32.mrf.mxu0 }
 0x81c   : > { %v1783_v44 = vadd.f32 %v1782_v21, %v1675_v20 }
 0x81d   : > { %v2313_v22 = vpop.f32.mrf.mxu0 }
 0x81e   : > { %1787 = vst.msk [vmem:[#allocation3] sm:$0x1] %vm1786_vm12, %v1783_v44 }
 0x820   : > { %v1881_v23 = vpop.f32.mrf.mxu1 }
 0x821   : > { %v1882_v41 = vadd.f32 %v1881_v23, %v1675_v20 }
 0x822   : > { %v2324_v24 = vpop.f32.mrf.mxu1 }
 0x823   : > { %1886 = vst.msk [vmem:[#allocation3 + $0x1] sm:$0x1] %vm1786_vm12, %v1882_v41 }
 0x824 PF: > { %s2924_s25 = sld [smem:[#allocation7_spill]]  ;;  %s2458_s14 = smov [#allocation3]  }
 0x825   : > { %s1896_s24 = sshll.u32 %s2458_s14, 4  ;;  %s1897_s24 = int_to_ptr.vmem [resolvable:$true] %s1896_s24 }
 0x826   : > { %s2401_s29 = scalar_lea.vmem %s1897_s24, 32  ;;  %p2408_p11 = scmp.lt.s32.totalorder %s1897_s24, %s1897_s24 }
 0x827   : > { %p2402_p8 = scmp.ne.s32.totalorder %s1897_s24, %s2401_s29  ;;  %p2409_p12 = scmp.lt.s32.totalorder %s2401_s29, %s2401_s29 }
 0x829   : > { %p2410_p13 = por %p2409_p12, %p2408_p11 }
 0x82a   : > { %s2925_s28 = sadd.s32 4294967295, %s2924_s25  }
 0x82b   : > { %p2855_p7 = scmp.eq.s32.totalorder %s2925_s28, 1 }
 0x82d   : > { %p2403_p9 = pnand %p2402_p8, %p2855_p7 }
 0x82f   : > { %p2404_p10 = pneg %p2403_p9 }
 0x831   : > { %p2411_p0 = pnand %p2410_p13, %p2404_p10 }
 0x833   : > { %2414 = shalt.err (!%p2411_p0)
}
 0x834   : > { %s2459_s3 = smov 16   ;;  %s2460_s5 = smov 1  }
 0x835   : > { %s2927_s27 = sld [smem:[#allocation17_spill]] }
 0x83b   : > { %2326 = dma.vmem_to_hbm [thread:$0]  (%p2855_p7), %s1897_s24, 32, %s2927_s27, [#allocation4], %s2459_s3, %s2459_s3, %s2460_s5  }
 0x83c   : > { %2438 = dma.done.wait (%p2855_p7), [#allocation4], 32  }
 0x83d   : > { %2440 = vsyncadd (%p2855_p7), [#allocation4], 4294967264 }
 0x83e PF: > { %s2928_s26 = sld [smem:[#allocation7_spill]] }
 0x83f   : > { %s2929_s24 = sld [smem:[#allocation6_spill]] }
 0x840   : > { %s2930_s25 = sld [smem:[#allocation8_spill]] }
 0x844   : > { %s28_s26 = sadd.s32 1, %s2928_s26  }
 0x845   : > { %p25_p1 = scmp.ge.s32.totalorder %s28_s26, 4  }
 0x847   :  { %27 = sbr.rel (!%p25_p1) target bundleno = 12 (0xc), region = 162 }
 0x84c   :  { %1912 = vsyncpa [#allocation4], 1 }
 0x84d   :  { %1914 = vsyncpa [#allocation4 + $0x1], 1 }

</bundles_post_ra>
